<compile_context>
chip_gen: v7x
topology: tpu7x:2x2x1
jax: 0.10.0
libtpu: 0.0.40
codegen_flags: <defaults>
</compile_context>

<pallas_src>
import functools
import math

import jax
import jax.numpy as jnp
import numpy as np
from jax.experimental import pallas as pl
from jax.experimental.pallas import tpu as pltpu

_LN_EPS = 1e-5  # torch.nn.LayerNorm default eps


def _layer_norm(x, g, b):
    mean = jnp.mean(x, axis=-1, keepdims=True)
    var = jnp.mean((x - mean) ** 2, axis=-1, keepdims=True)
    return (x - mean) * jax.lax.rsqrt(var + _LN_EPS) * g + b


def _build_tree(S):
    """Static structure of the ceil-split balanced fold.

    Returns (root_id, levels).  Leaves have ids 0..S-1.  levels[l] is a tuple
    of merges (left_id, right_id, alpha_leaf, new_id) that can all be evaluated
    together once every level < l is done.  alpha_leaf is the leftmost leaf of
    the right subtree (the blend-mask index used by the reference recursion).
    """
    merges_by_level = {}
    counter = [S]

    def rec(lo, hi):
        length = hi - lo
        if length == 1:
            return lo, 0, lo  # (node id, level, leftmost leaf)
        s1 = math.ceil(length / 2)
        lid, llev, lleft = rec(lo, lo + s1)
        rid, rlev, rleft = rec(lo + s1, hi)
        nid = counter[0]
        counter[0] += 1
        lev = 1 + max(llev, rlev)
        merges_by_level.setdefault(lev, []).append((lid, rid, rleft, nid))
        return nid, lev, lleft

    root, max_lev, _ = rec(0, S)
    levels = tuple(tuple(merges_by_level[l]) for l in range(1, max_lev + 1))
    return root, levels


def _crvnn_kernel(seq_ref, mask_ref, w_init_ref, b_init_ref, ln_g_ref,
                  ln_b_ref, w1l_ref, w1r_ref, b1_ref,
                  w2f1_ref, w2f2_ref, w2i_ref, w2p_ref,
                  b2f1_ref, b2f2_ref, b2i_ref, b2p_ref,
                  out_ref, *, activation, root, levels, compute_dtype):
    TN, S, D = seq_ref.shape

    mm = functools.partial(jnp.dot, preferred_element_type=jnp.float32)

    # Hoist parameter reads (and the optional matmul-dtype cast) once.
    w_init = w_init_ref[...].astype(compute_dtype)
    b_init = b_init_ref[...]
    ln_g, ln_b = ln_g_ref[...], ln_b_ref[...]
    w1l = w1l_ref[...].astype(compute_dtype)
    w1r = w1r_ref[...].astype(compute_dtype)
    b1 = b1_ref[...]
    w2f1 = w2f1_ref[...].astype(compute_dtype)
    w2f2 = w2f2_ref[...].astype(compute_dtype)
    w2i = w2i_ref[...].astype(compute_dtype)
    w2p = w2p_ref[...].astype(compute_dtype)
    b2f1, b2f2, b2i, b2p = (b2f1_ref[...], b2f2_ref[...],
                            b2i_ref[...], b2p_ref[...])

    def act(x):
        if activation == "relu":
            return jnp.maximum(x, 0.0)
        # exact (erf) gelu to match F.gelu; tanh-approx is cheaper on v5e.
        return jax.nn.gelu(x, approximate=False)

    mask = mask_ref[...]                                   # (TN, S, 1)
    x = seq_ref[...] * mask                                # sequence * mask
    y = mm(x.reshape(TN * S, D).astype(compute_dtype), w_init) + b_init
    y = _layer_norm(y, ln_g, ln_b)
    y = y.reshape(TN, S, D) * mask                         # (TN, S, D)

    # Leaf node values, each (TN, D).
    nodes = {i: y[:, i, :] for i in range(S)}

    # Level-batched balanced fold: one composer (two accumulated MXU matmuls
    # + four (C,D) gate matmuls) per level, covering every merge of the level.
    for merges in levels:
        left = jnp.concatenate([nodes[l] for (l, _r, _a, _n) in merges], axis=0)
        right = jnp.concatenate([nodes[r] for (_l, r, _a, _n) in merges], axis=0)
        alpha = jnp.concatenate([mask[:, a, :] for (_l, _r, a, _n) in merges],
                                axis=0)                    # (L*TN, 1)

        lc = left.astype(compute_dtype)
        rc = right.astype(compute_dtype)
        # wcell1 without a lane-axis concat.
        inter = act(mm(lc, w1l) + mm(rc, w1r) + b1)        # (L*TN, C)
        inter_c = inter.astype(compute_dtype)
        # wcell2 split column-wise -> no lane slicing of the 4D gate block.
        f1 = jax.nn.sigmoid(mm(inter_c, w2f1) + b2f1)
        f2 = jax.nn.sigmoid(mm(inter_c, w2f2) + b2f2)
        ig = jax.nn.sigmoid(mm(inter_c, w2i) + b2i)
        parent = mm(inter_c, w2p) + b2p
        comp = _layer_norm(f1 * left + f2 * right + ig * parent, ln_g, ln_b)
        res = alpha * comp + (1.0 - alpha) * left          # (L*TN, D)

        for k, (_l, _r, _a, nid) in enumerate(merges):
            nodes[nid] = res[k * TN:(k + 1) * TN, :]

    out_ref[...] = nodes[root].reshape(TN, 1, D)


def crvnn_balanced_forward(sequence, input_mask, params, *, activation="relu",
                           batch_tile=None, compute_dtype=jnp.float32):
    """Pallas wrapper.  sequence: (N,S,D) f32, input_mask: (N,S) f32."""
    N, S, D = sequence.shape
    if batch_tile is None:
        batch_tile = min(N, 8)
    assert N % batch_tile == 0, "batch must be divisible by batch_tile"
    TN = batch_tile

    root, levels = _build_tree(S)

    # Split composer weights in the wrapper (cheap one-time XLA slices) so the
    # kernel never concatenates or slices along the lane axis.
    w1 = params["w1"]                                      # (2D, C)
    w1l, w1r = w1[:D, :], w1[D:, :]
    w2 = params["w2"]                                      # (C, 4D)
    b2 = params["b2"]                                      # (1, 4D)
    w2f1, w2f2, w2i, w2p = (w2[:, 0 * D:1 * D], w2[:, 1 * D:2 * D],
                            w2[:, 2 * D:3 * D], w2[:, 3 * D:4 * D])
    b2f1, b2f2, b2i, b2p = (b2[:, 0 * D:1 * D], b2[:, 1 * D:2 * D],
                            b2[:, 2 * D:3 * D], b2[:, 3 * D:4 * D])

    mask3 = input_mask[:, :, None]                         # (N, S, 1)

    weights = (params["w_init"], params["b_init"], params["ln_g"],
               params["ln_b"], w1l, w1r, params["b1"],
               w2f1, w2f2, w2i, w2p, b2f1, b2f2, b2i, b2p)

    def const_spec(a):
        nd = a.ndim
        return pl.BlockSpec(a.shape, lambda i, _nd=nd: (0,) * _nd)

    kernel = functools.partial(_crvnn_kernel, activation=activation,
                               root=root, levels=levels,
                               compute_dtype=compute_dtype)

    out = pl.pallas_call(
        kernel,
        out_shape=jax.ShapeDtypeStruct((N, 1, D), jnp.float32),
        grid=(N // TN,),
        in_specs=[
            pl.BlockSpec((TN, S, D), lambda i: (i, 0, 0)),  # sequence
            pl.BlockSpec((TN, S, 1), lambda i: (i, 0, 0)),  # input mask
        ] + [const_spec(w) for w in weights],
        out_specs=pl.BlockSpec((TN, 1, D), lambda i: (i, 0, 0)),
        compiler_params=pltpu.CompilerParams(
            dimension_semantics=("parallel",),
            # 32 MiB scoped VMEM works on v5e/v6e (128 MiB physical) and
            # v7x (64 MiB physical); size batch_tile to stay well under it
            # at production shapes.
            vmem_limit_bytes=32 * 1024 * 1024,
        ),
    )(sequence, mask3, *weights)

    return {"sequence": out, "penalty": None, "global_state": out[:, 0, :]}


def reference_forward(sequence, input_mask, params, *, activation="relu"):
    """Pure-JAX direct translation of the PyTorch recursion (for checking)."""
    N, S, D = sequence.shape
    mask = input_mask[:, :, None]
    x = sequence * mask
    y = jnp.dot(x.reshape(N * S, D), params["w_init"],
                preferred_element_type=jnp.float32) + params["b_init"]
    y = _layer_norm(y, params["ln_g"], params["ln_b"])
    y = y.reshape(N, S, D) * mask

    def composer(c1, c2):
        cat = jnp.concatenate([c1, c2], axis=-1)
        inter = jnp.dot(cat, params["w1"],
                        preferred_element_type=jnp.float32) + params["b1"]
        if activation == "relu":
            inter = jnp.maximum(inter, 0.0)
        else:
            inter = jax.nn.gelu(inter, approximate=False)
        contents = jnp.dot(inter, params["w2"],
                           preferred_element_type=jnp.float32) + params["b2"]
        f1 = jax.nn.sigmoid(contents[:, 0 * D:1 * D])
        f2 = jax.nn.sigmoid(contents[:, 1 * D:2 * D])
        ig = jax.nn.sigmoid(contents[:, 2 * D:3 * D])
        parent = contents[:, 3 * D:4 * D]
        return _layer_norm(f1 * c1 + f2 * c2 + ig * parent,
                           params["ln_g"], params["ln_b"])

    def rec(lo, hi):  # (S==2 special case in PyTorch equals the general case)
        length = hi - lo
        if length == 1:
            return y[:, lo, :], input_mask[:, lo:lo + 1]
        s1 = math.ceil(length / 2)
        lval, lmask = rec(lo, lo + s1)
        rval, rmask = rec(lo + s1, hi)
        comp = composer(lval, rval)
        return rmask * comp + (1.0 - rmask) * lval, lmask

    result, _ = rec(0, S)
    return {"sequence": result[:, None, :], "penalty": None,
            "global_state": result}


def init_params(key, D, C):
    ks = jax.random.split(key, 8)
    return {
        # unused-by-forward parameters from __init__ (kept for fidelity)
        "START": jax.random.normal(ks[6], (D,), jnp.float32),
        "END": jax.random.normal(ks[7], (D,), jnp.float32),
        # initial_transform_layer: Linear(D, D)
        "w_init": jax.random.normal(ks[0], (D, D), jnp.float32) / math.sqrt(D),
        "b_init": jax.random.normal(ks[1], (1, D), jnp.float32) * 0.01,
        # shared LayerNorm(D)
        "ln_g": jnp.ones((1, D), jnp.float32),
        "ln_b": jnp.zeros((1, D), jnp.float32),
        # wcell1: Linear(2D, C)
        "w1": jax.random.normal(ks[2], (2 * D, C), jnp.float32) / math.sqrt(2 * D),
        "b1": jax.random.normal(ks[3], (1, C), jnp.float32) * 0.01,
        # wcell2: Linear(C, 4D)
        "w2": jax.random.normal(ks[4], (C, 4 * D), jnp.float32) / math.sqrt(C),
        "b2": jax.random.normal(ks[5], (1, 4 * D), jnp.float32) * 0.01,
    }


if __name__ == "__main__":
    config = {
        "hidden_size": 32,
        "cell_hidden_size": 64,
        "window_size": 5,
        "stop_threshold": 0.01,
        "halt_gamma": 0.01,
        "in_dropout": 0.0,
        "hidden_dropout": 0.0,
        "transition_features": False,
        "small_d": 16,
        "hidden_activation": "relu",
    }
    N, S = 2, 8
    D = config["hidden_size"]
    C = config["cell_hidden_size"]

    key = jax.random.PRNGKey(0)
    k_seq, k_par = jax.random.split(key)
    sequence = jax.random.normal(k_seq, (N, S, D), dtype=jnp.float32)
    input_mask = jnp.array(
        [[1, 1, 1, 1, 1, 1, 0, 0],
         [1, 1, 1, 1, 1, 1, 1, 1]], dtype=jnp.float32)
    params = init_params(k_par, D, C)

    out = crvnn_balanced_forward(
        sequence, input_mask, params,
        activation=config["hidden_activation"],
        batch_tile=1,                       # grid=(2,) -> pipelined batch tiles
        compute_dtype=jnp.float32)          # bf16 recommended on v6e/v7x
    jax.block_until_ready(out["global_state"])

    ref = reference_forward(sequence, input_mask, params,
                            activation=config["hidden_activation"])
    np.testing.assert_allclose(np.asarray(out["global_state"]),
                               np.asarray(ref["global_state"]),
                               rtol=1e-2, atol=1e-2)
    np.testing.assert_allclose(np.asarray(out["sequence"]),
                               np.asarray(ref["sequence"]),
                               rtol=1e-2, atol=1e-2)
    assert out["sequence"].shape == (N, 1, D)
    assert out["global_state"].shape == (N, D)
    assert out["penalty"] is None

    print("KERNEL_OK")
</pallas_src>

<mosaic_0001>
module attributes {stable_mosaic.version = 11 : i64} {
  func.func @_crvnn_kernel(%arg0: i32, %arg1: memref<1x8x32xf32, #tpu.memory_space<vmem>>, %arg2: memref<1x8x1xf32, #tpu.memory_space<vmem>>, %arg3: memref<32x32xf32, #tpu.memory_space<vmem>>, %arg4: memref<1x32xf32, #tpu.memory_space<vmem>>, %arg5: memref<1x32xf32, #tpu.memory_space<vmem>>, %arg6: memref<1x32xf32, #tpu.memory_space<vmem>>, %arg7: memref<32x64xf32, #tpu.memory_space<vmem>>, %arg8: memref<32x64xf32, #tpu.memory_space<vmem>>, %arg9: memref<1x64xf32, #tpu.memory_space<vmem>>, %arg10: memref<64x32xf32, #tpu.memory_space<vmem>>, %arg11: memref<64x32xf32, #tpu.memory_space<vmem>>, %arg12: memref<64x32xf32, #tpu.memory_space<vmem>>, %arg13: memref<64x32xf32, #tpu.memory_space<vmem>>, %arg14: memref<1x32xf32, #tpu.memory_space<vmem>>, %arg15: memref<1x32xf32, #tpu.memory_space<vmem>>, %arg16: memref<1x32xf32, #tpu.memory_space<vmem>>, %arg17: memref<1x32xf32, #tpu.memory_space<vmem>>, %arg18: memref<1x1x32xf32, #tpu.memory_space<vmem>>) attributes {dimension_semantics = [#tpu.dimension_semantics<parallel>], iteration_bounds = array<i64: 2>, scalar_prefetch = 0 : i64, scratch_operands = 0 : i64, tpu.core_type = #tpu.core_type<tc>, window_params = [{transform_indices = @transform_0, window_bounds = array<i64: 1, 8, 32>}, {transform_indices = @transform_1, window_bounds = array<i64: 1, 8, 1>}, {pipeline_mode = #tpu.pipeline_mode<synchronous>, transform_indices = @transform_2, window_bounds = array<i64: 32, 32>}, {pipeline_mode = #tpu.pipeline_mode<synchronous>, transform_indices = @transform_3, window_bounds = array<i64: 1, 32>}, {pipeline_mode = #tpu.pipeline_mode<synchronous>, transform_indices = @transform_4, window_bounds = array<i64: 1, 32>}, {pipeline_mode = #tpu.pipeline_mode<synchronous>, transform_indices = @transform_5, window_bounds = array<i64: 1, 32>}, {pipeline_mode = #tpu.pipeline_mode<synchronous>, transform_indices = @transform_6, window_bounds = array<i64: 32, 64>}, {pipeline_mode = #tpu.pipeline_mode<synchronous>, transform_indices = @transform_7, window_bounds = array<i64: 32, 64>}, {pipeline_mode = #tpu.pipeline_mode<synchronous>, transform_indices = @transform_8, window_bounds = array<i64: 1, 64>}, {pipeline_mode = #tpu.pipeline_mode<synchronous>, transform_indices = @transform_9, window_bounds = array<i64: 64, 32>}, {pipeline_mode = #tpu.pipeline_mode<synchronous>, transform_indices = @transform_10, window_bounds = array<i64: 64, 32>}, {pipeline_mode = #tpu.pipeline_mode<synchronous>, transform_indices = @transform_11, window_bounds = array<i64: 64, 32>}, {pipeline_mode = #tpu.pipeline_mode<synchronous>, transform_indices = @transform_12, window_bounds = array<i64: 64, 32>}, {pipeline_mode = #tpu.pipeline_mode<synchronous>, transform_indices = @transform_13, window_bounds = array<i64: 1, 32>}, {pipeline_mode = #tpu.pipeline_mode<synchronous>, transform_indices = @transform_14, window_bounds = array<i64: 1, 32>}, {pipeline_mode = #tpu.pipeline_mode<synchronous>, transform_indices = @transform_15, window_bounds = array<i64: 1, 32>}, {pipeline_mode = #tpu.pipeline_mode<synchronous>, transform_indices = @transform_16, window_bounds = array<i64: 1, 32>}, {transform_indices = @transform_17, window_bounds = array<i64: 1, 1, 32>}]} {
    %c0 = arith.constant 0 : index
    %c0_0 = arith.constant 0 : index
    %0 = vector.load %arg3[%c0, %c0_0] : memref<32x32xf32, #tpu.memory_space<vmem>>, vector<32x32xf32>
    %c0_1 = arith.constant 0 : index
    %c0_2 = arith.constant 0 : index
    %1 = vector.load %arg4[%c0_1, %c0_2] : memref<1x32xf32, #tpu.memory_space<vmem>>, vector<1x32xf32>
    %c0_3 = arith.constant 0 : index
    %c0_4 = arith.constant 0 : index
    %2 = vector.load %arg5[%c0_3, %c0_4] : memref<1x32xf32, #tpu.memory_space<vmem>>, vector<1x32xf32>
    %c0_5 = arith.constant 0 : index
    %c0_6 = arith.constant 0 : index
    %3 = vector.load %arg6[%c0_5, %c0_6] : memref<1x32xf32, #tpu.memory_space<vmem>>, vector<1x32xf32>
    %c0_7 = arith.constant 0 : index
    %c0_8 = arith.constant 0 : index
    %4 = vector.load %arg7[%c0_7, %c0_8] : memref<32x64xf32, #tpu.memory_space<vmem>>, vector<32x64xf32>
    %c0_9 = arith.constant 0 : index
    %c0_10 = arith.constant 0 : index
    %5 = vector.load %arg8[%c0_9, %c0_10] : memref<32x64xf32, #tpu.memory_space<vmem>>, vector<32x64xf32>
    %c0_11 = arith.constant 0 : index
    %c0_12 = arith.constant 0 : index
    %6 = vector.load %arg9[%c0_11, %c0_12] : memref<1x64xf32, #tpu.memory_space<vmem>>, vector<1x64xf32>
    %c0_13 = arith.constant 0 : index
    %c0_14 = arith.constant 0 : index
    %7 = vector.load %arg10[%c0_13, %c0_14] : memref<64x32xf32, #tpu.memory_space<vmem>>, vector<64x32xf32>
    %c0_15 = arith.constant 0 : index
    %c0_16 = arith.constant 0 : index
    %8 = vector.load %arg11[%c0_15, %c0_16] : memref<64x32xf32, #tpu.memory_space<vmem>>, vector<64x32xf32>
    %c0_17 = arith.constant 0 : index
    %c0_18 = arith.constant 0 : index
    %9 = vector.load %arg12[%c0_17, %c0_18] : memref<64x32xf32, #tpu.memory_space<vmem>>, vector<64x32xf32>
    %c0_19 = arith.constant 0 : index
    %c0_20 = arith.constant 0 : index
    %10 = vector.load %arg13[%c0_19, %c0_20] : memref<64x32xf32, #tpu.memory_space<vmem>>, vector<64x32xf32>
    %c0_21 = arith.constant 0 : index
    %c0_22 = arith.constant 0 : index
    %11 = vector.load %arg14[%c0_21, %c0_22] : memref<1x32xf32, #tpu.memory_space<vmem>>, vector<1x32xf32>
    %c0_23 = arith.constant 0 : index
    %c0_24 = arith.constant 0 : index
    %12 = vector.load %arg15[%c0_23, %c0_24] : memref<1x32xf32, #tpu.memory_space<vmem>>, vector<1x32xf32>
    %c0_25 = arith.constant 0 : index
    %c0_26 = arith.constant 0 : index
    %13 = vector.load %arg16[%c0_25, %c0_26] : memref<1x32xf32, #tpu.memory_space<vmem>>, vector<1x32xf32>
    %c0_27 = arith.constant 0 : index
    %c0_28 = arith.constant 0 : index
    %14 = vector.load %arg17[%c0_27, %c0_28] : memref<1x32xf32, #tpu.memory_space<vmem>>, vector<1x32xf32>
    %c0_29 = arith.constant 0 : index
    %c0_30 = arith.constant 0 : index
    %c0_31 = arith.constant 0 : index
    %15 = vector.load %arg2[%c0_29, %c0_30, %c0_31] : memref<1x8x1xf32, #tpu.memory_space<vmem>>, vector<1x8x1xf32>
    %c0_32 = arith.constant 0 : index
    %c0_33 = arith.constant 0 : index
    %c0_34 = arith.constant 0 : index
    %16 = vector.load %arg1[%c0_32, %c0_33, %c0_34] : memref<1x8x32xf32, #tpu.memory_space<vmem>>, vector<1x8x32xf32>
    %17 = vector.broadcast %15 : vector<1x8x1xf32> to vector<1x8x32xf32>
    %18 = arith.mulf %16, %17 : vector<1x8x32xf32>
    %19 = vector.shape_cast %18 : vector<1x8x32xf32> to vector<8x32xf32>
    %cst = arith.constant dense<0.000000e+00> : vector<8x32xf32>
    %20 = tpu.matmul %19, %0, %cst {dimension_numbers = #tpu.dot_dimension_numbers<[1], [0], [0], [1], [0, 0, 1, 1], [], []>} : vector<8x32xf32>, vector<32x32xf32>, vector<8x32xf32> -> vector<8x32xf32>
    %21 = vector.broadcast %1 : vector<1x32xf32> to vector<8x32xf32>
    %22 = arith.addf %20, %21 : vector<8x32xf32>
    %cst_35 = arith.constant dense<0.000000e+00> : vector<8xf32>
    %23 = vector.multi_reduction <add>, %22, %cst_35 [1] : vector<8x32xf32> to vector<8xf32>
    %24 = vector.shape_cast %23 : vector<8xf32> to vector<8x1xf32>
    %cst_36 = arith.constant 3.200000e+01 : f32
    %25 = vector.broadcast %cst_36 : f32 to vector<8x1xf32>
    %26 = arith.divf %24, %25 : vector<8x1xf32>
    %27 = vector.broadcast %26 : vector<8x1xf32> to vector<8x32xf32>
    %28 = arith.subf %22, %27 : vector<8x32xf32>
    %29 = arith.mulf %28, %28 : vector<8x32xf32>
    %cst_37 = arith.constant dense<0.000000e+00> : vector<8xf32>
    %30 = vector.multi_reduction <add>, %29, %cst_37 [1] : vector<8x32xf32> to vector<8xf32>
    %31 = vector.shape_cast %30 : vector<8xf32> to vector<8x1xf32>
    %cst_38 = arith.constant 3.200000e+01 : f32
    %32 = vector.broadcast %cst_38 : f32 to vector<8x1xf32>
    %33 = arith.divf %31, %32 : vector<8x1xf32>
    %34 = vector.broadcast %26 : vector<8x1xf32> to vector<8x32xf32>
    %35 = arith.subf %22, %34 : vector<8x32xf32>
    %cst_39 = arith.constant 9.99999974E-6 : f32
    %36 = vector.broadcast %cst_39 : f32 to vector<8x1xf32>
    %37 = arith.addf %33, %36 : vector<8x1xf32>
    %38 = math.rsqrt %37 : vector<8x1xf32>
    %39 = vector.broadcast %38 : vector<8x1xf32> to vector<8x32xf32>
    %40 = arith.mulf %35, %39 : vector<8x32xf32>
    %41 = vector.broadcast %2 : vector<1x32xf32> to vector<8x32xf32>
    %42 = arith.mulf %40, %41 : vector<8x32xf32>
    %43 = vector.broadcast %3 : vector<1x32xf32> to vector<8x32xf32>
    %44 = arith.addf %42, %43 : vector<8x32xf32>
    %45 = vector.shape_cast %44 : vector<8x32xf32> to vector<1x8x32xf32>
    %46 = vector.broadcast %15 : vector<1x8x1xf32> to vector<1x8x32xf32>
    %47 = arith.mulf %45, %46 : vector<1x8x32xf32>
    %48 = vector.extract_strided_slice %47 {offsets = [0, 0, 0], sizes = [1, 1, 32], strides = [1, 1, 1]} : vector<1x8x32xf32> to vector<1x1x32xf32>
    %49 = vector.shape_cast %48 : vector<1x1x32xf32> to vector<1x32xf32>
    %50 = vector.extract_strided_slice %47 {offsets = [0, 1, 0], sizes = [1, 1, 32], strides = [1, 1, 1]} : vector<1x8x32xf32> to vector<1x1x32xf32>
    %51 = vector.shape_cast %50 : vector<1x1x32xf32> to vector<1x32xf32>
    %52 = vector.extract_strided_slice %47 {offsets = [0, 2, 0], sizes = [1, 1, 32], strides = [1, 1, 1]} : vector<1x8x32xf32> to vector<1x1x32xf32>
    %53 = vector.shape_cast %52 : vector<1x1x32xf32> to vector<1x32xf32>
    %54 = vector.extract_strided_slice %47 {offsets = [0, 3, 0], sizes = [1, 1, 32], strides = [1, 1, 1]} : vector<1x8x32xf32> to vector<1x1x32xf32>
    %55 = vector.shape_cast %54 : vector<1x1x32xf32> to vector<1x32xf32>
    %56 = vector.extract_strided_slice %47 {offsets = [0, 4, 0], sizes = [1, 1, 32], strides = [1, 1, 1]} : vector<1x8x32xf32> to vector<1x1x32xf32>
    %57 = vector.shape_cast %56 : vector<1x1x32xf32> to vector<1x32xf32>
    %58 = vector.extract_strided_slice %47 {offsets = [0, 5, 0], sizes = [1, 1, 32], strides = [1, 1, 1]} : vector<1x8x32xf32> to vector<1x1x32xf32>
    %59 = vector.shape_cast %58 : vector<1x1x32xf32> to vector<1x32xf32>
    %60 = vector.extract_strided_slice %47 {offsets = [0, 6, 0], sizes = [1, 1, 32], strides = [1, 1, 1]} : vector<1x8x32xf32> to vector<1x1x32xf32>
    %61 = vector.shape_cast %60 : vector<1x1x32xf32> to vector<1x32xf32>
    %62 = vector.extract_strided_slice %47 {offsets = [0, 7, 0], sizes = [1, 1, 32], strides = [1, 1, 1]} : vector<1x8x32xf32> to vector<1x1x32xf32>
    %63 = vector.shape_cast %62 : vector<1x1x32xf32> to vector<1x32xf32>
    %64 = tpu.concatenate %49, %53, %57, %61 in 0 : vector<1x32xf32>, vector<1x32xf32>, vector<1x32xf32>, vector<1x32xf32> -> vector<4x32xf32>
    %65 = tpu.concatenate %51, %55, %59, %63 in 0 : vector<1x32xf32>, vector<1x32xf32>, vector<1x32xf32>, vector<1x32xf32> -> vector<4x32xf32>
    %66 = vector.extract_strided_slice %15 {offsets = [0, 1, 0], sizes = [1, 1, 1], strides = [1, 1, 1]} : vector<1x8x1xf32> to vector<1x1x1xf32>
    %67 = vector.shape_cast %66 : vector<1x1x1xf32> to vector<1x1xf32>
    %68 = vector.extract_strided_slice %15 {offsets = [0, 3, 0], sizes = [1, 1, 1], strides = [1, 1, 1]} : vector<1x8x1xf32> to vector<1x1x1xf32>
    %69 = vector.shape_cast %68 : vector<1x1x1xf32> to vector<1x1xf32>
    %70 = vector.extract_strided_slice %15 {offsets = [0, 5, 0], sizes = [1, 1, 1], strides = [1, 1, 1]} : vector<1x8x1xf32> to vector<1x1x1xf32>
    %71 = vector.shape_cast %70 : vector<1x1x1xf32> to vector<1x1xf32>
    %72 = vector.extract_strided_slice %15 {offsets = [0, 7, 0], sizes = [1, 1, 1], strides = [1, 1, 1]} : vector<1x8x1xf32> to vector<1x1x1xf32>
    %73 = vector.shape_cast %72 : vector<1x1x1xf32> to vector<1x1xf32>
    %74 = tpu.concatenate %67, %69, %71, %73 in 0 : vector<1x1xf32>, vector<1x1xf32>, vector<1x1xf32>, vector<1x1xf32> -> vector<4x1xf32>
    %cst_40 = arith.constant dense<0.000000e+00> : vector<4x64xf32>
    %75 = tpu.matmul %64, %4, %cst_40 {dimension_numbers = #tpu.dot_dimension_numbers<[1], [0], [0], [1], [0, 0, 1, 1], [], []>} : vector<4x32xf32>, vector<32x64xf32>, vector<4x64xf32> -> vector<4x64xf32>
    %cst_41 = arith.constant dense<0.000000e+00> : vector<4x64xf32>
    %76 = tpu.matmul %65, %5, %cst_41 {dimension_numbers = #tpu.dot_dimension_numbers<[1], [0], [0], [1], [0, 0, 1, 1], [], []>} : vector<4x32xf32>, vector<32x64xf32>, vector<4x64xf32> -> vector<4x64xf32>
    %77 = arith.addf %75, %76 : vector<4x64xf32>
    %78 = vector.broadcast %6 : vector<1x64xf32> to vector<4x64xf32>
    %79 = arith.addf %77, %78 : vector<4x64xf32>
    %cst_42 = arith.constant 0.000000e+00 : f32
    %80 = vector.broadcast %cst_42 : f32 to vector<4x64xf32>
    %81 = arith.maximumf %79, %80 : vector<4x64xf32>
    %cst_43 = arith.constant dense<0.000000e+00> : vector<4x32xf32>
    %82 = tpu.matmul %81, %7, %cst_43 {dimension_numbers = #tpu.dot_dimension_numbers<[1], [0], [0], [1], [0, 0, 1, 1], [], []>} : vector<4x64xf32>, vector<64x32xf32>, vector<4x32xf32> -> vector<4x32xf32>
    %83 = vector.broadcast %11 : vector<1x32xf32> to vector<4x32xf32>
    %84 = arith.addf %82, %83 : vector<4x32xf32>
    %85 = arith.negf %84 : vector<4x32xf32>
    %86 = math.exp %85 : vector<4x32xf32>
    %cst_44 = arith.constant 1.000000e+00 : f32
    %87 = vector.broadcast %cst_44 : f32 to vector<4x32xf32>
    %88 = arith.addf %87, %86 : vector<4x32xf32>
    %89 = arith.divf %87, %88 : vector<4x32xf32>
    %cst_45 = arith.constant dense<0.000000e+00> : vector<4x32xf32>
    %90 = tpu.matmul %81, %8, %cst_45 {dimension_numbers = #tpu.dot_dimension_numbers<[1], [0], [0], [1], [0, 0, 1, 1], [], []>} : vector<4x64xf32>, vector<64x32xf32>, vector<4x32xf32> -> vector<4x32xf32>
    %91 = vector.broadcast %12 : vector<1x32xf32> to vector<4x32xf32>
    %92 = arith.addf %90, %91 : vector<4x32xf32>
    %93 = arith.negf %92 : vector<4x32xf32>
    %94 = math.exp %93 : vector<4x32xf32>
    %cst_46 = arith.constant 1.000000e+00 : f32
    %95 = vector.broadcast %cst_46 : f32 to vector<4x32xf32>
    %96 = arith.addf %95, %94 : vector<4x32xf32>
    %97 = arith.divf %95, %96 : vector<4x32xf32>
    %cst_47 = arith.constant dense<0.000000e+00> : vector<4x32xf32>
    %98 = tpu.matmul %81, %9, %cst_47 {dimension_numbers = #tpu.dot_dimension_numbers<[1], [0], [0], [1], [0, 0, 1, 1], [], []>} : vector<4x64xf32>, vector<64x32xf32>, vector<4x32xf32> -> vector<4x32xf32>
    %99 = vector.broadcast %13 : vector<1x32xf32> to vector<4x32xf32>
    %100 = arith.addf %98, %99 : vector<4x32xf32>
    %101 = arith.negf %100 : vector<4x32xf32>
    %102 = math.exp %101 : vector<4x32xf32>
    %cst_48 = arith.constant 1.000000e+00 : f32
    %103 = vector.broadcast %cst_48 : f32 to vector<4x32xf32>
    %104 = arith.addf %103, %102 : vector<4x32xf32>
    %105 = arith.divf %103, %104 : vector<4x32xf32>
    %cst_49 = arith.constant dense<0.000000e+00> : vector<4x32xf32>
    %106 = tpu.matmul %81, %10, %cst_49 {dimension_numbers = #tpu.dot_dimension_numbers<[1], [0], [0], [1], [0, 0, 1, 1], [], []>} : vector<4x64xf32>, vector<64x32xf32>, vector<4x32xf32> -> vector<4x32xf32>
    %107 = vector.broadcast %14 : vector<1x32xf32> to vector<4x32xf32>
    %108 = arith.addf %106, %107 : vector<4x32xf32>
    %109 = arith.mulf %89, %64 : vector<4x32xf32>
    %110 = arith.mulf %97, %65 : vector<4x32xf32>
    %111 = arith.addf %109, %110 : vector<4x32xf32>
    %112 = arith.mulf %105, %108 : vector<4x32xf32>
    %113 = arith.addf %111, %112 : vector<4x32xf32>
    %cst_50 = arith.constant dense<0.000000e+00> : vector<4xf32>
    %114 = vector.multi_reduction <add>, %113, %cst_50 [1] : vector<4x32xf32> to vector<4xf32>
    %115 = vector.shape_cast %114 : vector<4xf32> to vector<4x1xf32>
    %cst_51 = arith.constant 3.200000e+01 : f32
    %116 = vector.broadcast %cst_51 : f32 to vector<4x1xf32>
    %117 = arith.divf %115, %116 : vector<4x1xf32>
    %118 = vector.broadcast %117 : vector<4x1xf32> to vector<4x32xf32>
    %119 = arith.subf %113, %118 : vector<4x32xf32>
    %120 = arith.mulf %119, %119 : vector<4x32xf32>
    %cst_52 = arith.constant dense<0.000000e+00> : vector<4xf32>
    %121 = vector.multi_reduction <add>, %120, %cst_52 [1] : vector<4x32xf32> to vector<4xf32>
    %122 = vector.shape_cast %121 : vector<4xf32> to vector<4x1xf32>
    %cst_53 = arith.constant 3.200000e+01 : f32
    %123 = vector.broadcast %cst_53 : f32 to vector<4x1xf32>
    %124 = arith.divf %122, %123 : vector<4x1xf32>
    %125 = vector.broadcast %117 : vector<4x1xf32> to vector<4x32xf32>
    %126 = arith.subf %113, %125 : vector<4x32xf32>
    %cst_54 = arith.constant 9.99999974E-6 : f32
    %127 = vector.broadcast %cst_54 : f32 to vector<4x1xf32>
    %128 = arith.addf %124, %127 : vector<4x1xf32>
    %129 = math.rsqrt %128 : vector<4x1xf32>
    %130 = vector.broadcast %129 : vector<4x1xf32> to vector<4x32xf32>
    %131 = arith.mulf %126, %130 : vector<4x32xf32>
    %132 = vector.broadcast %2 : vector<1x32xf32> to vector<4x32xf32>
    %133 = arith.mulf %131, %132 : vector<4x32xf32>
    %134 = vector.broadcast %3 : vector<1x32xf32> to vector<4x32xf32>
    %135 = arith.addf %133, %134 : vector<4x32xf32>
    %136 = vector.broadcast %74 : vector<4x1xf32> to vector<4x32xf32>
    %137 = arith.mulf %136, %135 : vector<4x32xf32>
    %cst_55 = arith.constant 1.000000e+00 : f32
    %138 = vector.broadcast %cst_55 : f32 to vector<4x1xf32>
    %139 = arith.subf %138, %74 : vector<4x1xf32>
    %140 = vector.broadcast %139 : vector<4x1xf32> to vector<4x32xf32>
    %141 = arith.mulf %140, %64 : vector<4x32xf32>
    %142 = arith.addf %137, %141 : vector<4x32xf32>
    %143 = vector.extract_strided_slice %142 {offsets = [0, 0], sizes = [1, 32], strides = [1, 1]} : vector<4x32xf32> to vector<1x32xf32>
    %144 = vector.extract_strided_slice %142 {offsets = [1, 0], sizes = [1, 32], strides = [1, 1]} : vector<4x32xf32> to vector<1x32xf32>
    %145 = vector.extract_strided_slice %142 {offsets = [2, 0], sizes = [1, 32], strides = [1, 1]} : vector<4x32xf32> to vector<1x32xf32>
    %146 = vector.extract_strided_slice %142 {offsets = [3, 0], sizes = [1, 32], strides = [1, 1]} : vector<4x32xf32> to vector<1x32xf32>
    %147 = tpu.concatenate %143, %145 in 0 : vector<1x32xf32>, vector<1x32xf32> -> vector<2x32xf32>
    %148 = tpu.concatenate %144, %146 in 0 : vector<1x32xf32>, vector<1x32xf32> -> vector<2x32xf32>
    %149 = vector.extract_strided_slice %15 {offsets = [0, 2, 0], sizes = [1, 1, 1], strides = [1, 1, 1]} : vector<1x8x1xf32> to vector<1x1x1xf32>
    %150 = vector.shape_cast %149 : vector<1x1x1xf32> to vector<1x1xf32>
    %151 = vector.extract_strided_slice %15 {offsets = [0, 6, 0], sizes = [1, 1, 1], strides = [1, 1, 1]} : vector<1x8x1xf32> to vector<1x1x1xf32>
    %152 = vector.shape_cast %151 : vector<1x1x1xf32> to vector<1x1xf32>
    %153 = tpu.concatenate %150, %152 in 0 : vector<1x1xf32>, vector<1x1xf32> -> vector<2x1xf32>
    %cst_56 = arith.constant dense<0.000000e+00> : vector<2x64xf32>
    %154 = tpu.matmul %147, %4, %cst_56 {dimension_numbers = #tpu.dot_dimension_numbers<[1], [0], [0], [1], [0, 0, 1, 1], [], []>} : vector<2x32xf32>, vector<32x64xf32>, vector<2x64xf32> -> vector<2x64xf32>
    %cst_57 = arith.constant dense<0.000000e+00> : vector<2x64xf32>
    %155 = tpu.matmul %148, %5, %cst_57 {dimension_numbers = #tpu.dot_dimension_numbers<[1], [0], [0], [1], [0, 0, 1, 1], [], []>} : vector<2x32xf32>, vector<32x64xf32>, vector<2x64xf32> -> vector<2x64xf32>
    %156 = arith.addf %154, %155 : vector<2x64xf32>
    %157 = vector.broadcast %6 : vector<1x64xf32> to vector<2x64xf32>
    %158 = arith.addf %156, %157 : vector<2x64xf32>
    %cst_58 = arith.constant 0.000000e+00 : f32
    %159 = vector.broadcast %cst_58 : f32 to vector<2x64xf32>
    %160 = arith.maximumf %158, %159 : vector<2x64xf32>
    %cst_59 = arith.constant dense<0.000000e+00> : vector<2x32xf32>
    %161 = tpu.matmul %160, %7, %cst_59 {dimension_numbers = #tpu.dot_dimension_numbers<[1], [0], [0], [1], [0, 0, 1, 1], [], []>} : vector<2x64xf32>, vector<64x32xf32>, vector<2x32xf32> -> vector<2x32xf32>
    %162 = vector.broadcast %11 : vector<1x32xf32> to vector<2x32xf32>
    %163 = arith.addf %161, %162 : vector<2x32xf32>
    %164 = arith.negf %163 : vector<2x32xf32>
    %165 = math.exp %164 : vector<2x32xf32>
    %cst_60 = arith.constant 1.000000e+00 : f32
    %166 = vector.broadcast %cst_60 : f32 to vector<2x32xf32>
    %167 = arith.addf %166, %165 : vector<2x32xf32>
    %168 = arith.divf %166, %167 : vector<2x32xf32>
    %cst_61 = arith.constant dense<0.000000e+00> : vector<2x32xf32>
    %169 = tpu.matmul %160, %8, %cst_61 {dimension_numbers = #tpu.dot_dimension_numbers<[1], [0], [0], [1], [0, 0, 1, 1], [], []>} : vector<2x64xf32>, vector<64x32xf32>, vector<2x32xf32> -> vector<2x32xf32>
    %170 = vector.broadcast %12 : vector<1x32xf32> to vector<2x32xf32>
    %171 = arith.addf %169, %170 : vector<2x32xf32>
    %172 = arith.negf %171 : vector<2x32xf32>
    %173 = math.exp %172 : vector<2x32xf32>
    %cst_62 = arith.constant 1.000000e+00 : f32
    %174 = vector.broadcast %cst_62 : f32 to vector<2x32xf32>
    %175 = arith.addf %174, %173 : vector<2x32xf32>
    %176 = arith.divf %174, %175 : vector<2x32xf32>
    %cst_63 = arith.constant dense<0.000000e+00> : vector<2x32xf32>
    %177 = tpu.matmul %160, %9, %cst_63 {dimension_numbers = #tpu.dot_dimension_numbers<[1], [0], [0], [1], [0, 0, 1, 1], [], []>} : vector<2x64xf32>, vector<64x32xf32>, vector<2x32xf32> -> vector<2x32xf32>
    %178 = vector.broadcast %13 : vector<1x32xf32> to vector<2x32xf32>
    %179 = arith.addf %177, %178 : vector<2x32xf32>
    %180 = arith.negf %179 : vector<2x32xf32>
    %181 = math.exp %180 : vector<2x32xf32>
    %cst_64 = arith.constant 1.000000e+00 : f32
    %182 = vector.broadcast %cst_64 : f32 to vector<2x32xf32>
    %183 = arith.addf %182, %181 : vector<2x32xf32>
    %184 = arith.divf %182, %183 : vector<2x32xf32>
    %cst_65 = arith.constant dense<0.000000e+00> : vector<2x32xf32>
    %185 = tpu.matmul %160, %10, %cst_65 {dimension_numbers = #tpu.dot_dimension_numbers<[1], [0], [0], [1], [0, 0, 1, 1], [], []>} : vector<2x64xf32>, vector<64x32xf32>, vector<2x32xf32> -> vector<2x32xf32>
    %186 = vector.broadcast %14 : vector<1x32xf32> to vector<2x32xf32>
    %187 = arith.addf %185, %186 : vector<2x32xf32>
    %188 = arith.mulf %168, %147 : vector<2x32xf32>
    %189 = arith.mulf %176, %148 : vector<2x32xf32>
    %190 = arith.addf %188, %189 : vector<2x32xf32>
    %191 = arith.mulf %184, %187 : vector<2x32xf32>
    %192 = arith.addf %190, %191 : vector<2x32xf32>
    %cst_66 = arith.constant dense<0.000000e+00> : vector<2xf32>
    %193 = vector.multi_reduction <add>, %192, %cst_66 [1] : vector<2x32xf32> to vector<2xf32>
    %194 = vector.shape_cast %193 : vector<2xf32> to vector<2x1xf32>
    %cst_67 = arith.constant 3.200000e+01 : f32
    %195 = vector.broadcast %cst_67 : f32 to vector<2x1xf32>
    %196 = arith.divf %194, %195 : vector<2x1xf32>
    %197 = vector.broadcast %196 : vector<2x1xf32> to vector<2x32xf32>
    %198 = arith.subf %192, %197 : vector<2x32xf32>
    %199 = arith.mulf %198, %198 : vector<2x32xf32>
    %cst_68 = arith.constant dense<0.000000e+00> : vector<2xf32>
    %200 = vector.multi_reduction <add>, %199, %cst_68 [1] : vector<2x32xf32> to vector<2xf32>
    %201 = vector.shape_cast %200 : vector<2xf32> to vector<2x1xf32>
    %cst_69 = arith.constant 3.200000e+01 : f32
    %202 = vector.broadcast %cst_69 : f32 to vector<2x1xf32>
    %203 = arith.divf %201, %202 : vector<2x1xf32>
    %204 = vector.broadcast %196 : vector<2x1xf32> to vector<2x32xf32>
    %205 = arith.subf %192, %204 : vector<2x32xf32>
    %cst_70 = arith.constant 9.99999974E-6 : f32
    %206 = vector.broadcast %cst_70 : f32 to vector<2x1xf32>
    %207 = arith.addf %203, %206 : vector<2x1xf32>
    %208 = math.rsqrt %207 : vector<2x1xf32>
    %209 = vector.broadcast %208 : vector<2x1xf32> to vector<2x32xf32>
    %210 = arith.mulf %205, %209 : vector<2x32xf32>
    %211 = vector.broadcast %2 : vector<1x32xf32> to vector<2x32xf32>
    %212 = arith.mulf %210, %211 : vector<2x32xf32>
    %213 = vector.broadcast %3 : vector<1x32xf32> to vector<2x32xf32>
    %214 = arith.addf %212, %213 : vector<2x32xf32>
    %215 = vector.broadcast %153 : vector<2x1xf32> to vector<2x32xf32>
    %216 = arith.mulf %215, %214 : vector<2x32xf32>
    %cst_71 = arith.constant 1.000000e+00 : f32
    %217 = vector.broadcast %cst_71 : f32 to vector<2x1xf32>
    %218 = arith.subf %217, %153 : vector<2x1xf32>
    %219 = vector.broadcast %218 : vector<2x1xf32> to vector<2x32xf32>
    %220 = arith.mulf %219, %147 : vector<2x32xf32>
    %221 = arith.addf %216, %220 : vector<2x32xf32>
    %222 = vector.extract_strided_slice %221 {offsets = [0, 0], sizes = [1, 32], strides = [1, 1]} : vector<2x32xf32> to vector<1x32xf32>
    %223 = vector.extract_strided_slice %221 {offsets = [1, 0], sizes = [1, 32], strides = [1, 1]} : vector<2x32xf32> to vector<1x32xf32>
    %224 = vector.extract_strided_slice %15 {offsets = [0, 4, 0], sizes = [1, 1, 1], strides = [1, 1, 1]} : vector<1x8x1xf32> to vector<1x1x1xf32>
    %225 = vector.shape_cast %224 : vector<1x1x1xf32> to vector<1x1xf32>
    %cst_72 = arith.constant dense<0.000000e+00> : vector<1x64xf32>
    %226 = tpu.matmul %222, %4, %cst_72 {dimension_numbers = #tpu.dot_dimension_numbers<[1], [0], [0], [1], [0, 0, 1, 1], [], []>} : vector<1x32xf32>, vector<32x64xf32>, vector<1x64xf32> -> vector<1x64xf32>
    %cst_73 = arith.constant dense<0.000000e+00> : vector<1x64xf32>
    %227 = tpu.matmul %223, %5, %cst_73 {dimension_numbers = #tpu.dot_dimension_numbers<[1], [0], [0], [1], [0, 0, 1, 1], [], []>} : vector<1x32xf32>, vector<32x64xf32>, vector<1x64xf32> -> vector<1x64xf32>
    %228 = arith.addf %226, %227 : vector<1x64xf32>
    %229 = arith.addf %228, %6 : vector<1x64xf32>
    %cst_74 = arith.constant 0.000000e+00 : f32
    %230 = vector.broadcast %cst_74 : f32 to vector<1x64xf32>
    %231 = arith.maximumf %229, %230 : vector<1x64xf32>
    %cst_75 = arith.constant dense<0.000000e+00> : vector<1x32xf32>
    %232 = tpu.matmul %231, %7, %cst_75 {dimension_numbers = #tpu.dot_dimension_numbers<[1], [0], [0], [1], [0, 0, 1, 1], [], []>} : vector<1x64xf32>, vector<64x32xf32>, vector<1x32xf32> -> vector<1x32xf32>
    %233 = arith.addf %232, %11 : vector<1x32xf32>
    %234 = arith.negf %233 : vector<1x32xf32>
    %235 = math.exp %234 : vector<1x32xf32>
    %cst_76 = arith.constant 1.000000e+00 : f32
    %236 = vector.broadcast %cst_76 : f32 to vector<1x32xf32>
    %237 = arith.addf %236, %235 : vector<1x32xf32>
    %238 = arith.divf %236, %237 : vector<1x32xf32>
    %cst_77 = arith.constant dense<0.000000e+00> : vector<1x32xf32>
    %239 = tpu.matmul %231, %8, %cst_77 {dimension_numbers = #tpu.dot_dimension_numbers<[1], [0], [0], [1], [0, 0, 1, 1], [], []>} : vector<1x64xf32>, vector<64x32xf32>, vector<1x32xf32> -> vector<1x32xf32>
    %240 = arith.addf %239, %12 : vector<1x32xf32>
    %241 = arith.negf %240 : vector<1x32xf32>
    %242 = math.exp %241 : vector<1x32xf32>
    %cst_78 = arith.constant 1.000000e+00 : f32
    %243 = vector.broadcast %cst_78 : f32 to vector<1x32xf32>
    %244 = arith.addf %243, %242 : vector<1x32xf32>
    %245 = arith.divf %243, %244 : vector<1x32xf32>
    %cst_79 = arith.constant dense<0.000000e+00> : vector<1x32xf32>
    %246 = tpu.matmul %231, %9, %cst_79 {dimension_numbers = #tpu.dot_dimension_numbers<[1], [0], [0], [1], [0, 0, 1, 1], [], []>} : vector<1x64xf32>, vector<64x32xf32>, vector<1x32xf32> -> vector<1x32xf32>
    %247 = arith.addf %246, %13 : vector<1x32xf32>
    %248 = arith.negf %247 : vector<1x32xf32>
    %249 = math.exp %248 : vector<1x32xf32>
    %cst_80 = arith.constant 1.000000e+00 : f32
    %250 = vector.broadcast %cst_80 : f32 to vector<1x32xf32>
    %251 = arith.addf %250, %249 : vector<1x32xf32>
    %252 = arith.divf %250, %251 : vector<1x32xf32>
    %cst_81 = arith.constant dense<0.000000e+00> : vector<1x32xf32>
    %253 = tpu.matmul %231, %10, %cst_81 {dimension_numbers = #tpu.dot_dimension_numbers<[1], [0], [0], [1], [0, 0, 1, 1], [], []>} : vector<1x64xf32>, vector<64x32xf32>, vector<1x32xf32> -> vector<1x32xf32>
    %254 = arith.addf %253, %14 : vector<1x32xf32>
    %255 = arith.mulf %238, %222 : vector<1x32xf32>
    %256 = arith.mulf %245, %223 : vector<1x32xf32>
    %257 = arith.addf %255, %256 : vector<1x32xf32>
    %258 = arith.mulf %252, %254 : vector<1x32xf32>
    %259 = arith.addf %257, %258 : vector<1x32xf32>
    %cst_82 = arith.constant dense<0.000000e+00> : vector<1xf32>
    %260 = vector.multi_reduction <add>, %259, %cst_82 [1] : vector<1x32xf32> to vector<1xf32>
    %261 = vector.shape_cast %260 : vector<1xf32> to vector<1x1xf32>
    %cst_83 = arith.constant 3.200000e+01 : f32
    %262 = vector.broadcast %cst_83 : f32 to vector<1x1xf32>
    %263 = arith.divf %261, %262 : vector<1x1xf32>
    %264 = vector.broadcast %263 : vector<1x1xf32> to vector<1x32xf32>
    %265 = arith.subf %259, %264 : vector<1x32xf32>
    %266 = arith.mulf %265, %265 : vector<1x32xf32>
    %cst_84 = arith.constant dense<0.000000e+00> : vector<1xf32>
    %267 = vector.multi_reduction <add>, %266, %cst_84 [1] : vector<1x32xf32> to vector<1xf32>
    %268 = vector.shape_cast %267 : vector<1xf32> to vector<1x1xf32>
    %cst_85 = arith.constant 3.200000e+01 : f32
    %269 = vector.broadcast %cst_85 : f32 to vector<1x1xf32>
    %270 = arith.divf %268, %269 : vector<1x1xf32>
    %271 = vector.broadcast %263 : vector<1x1xf32> to vector<1x32xf32>
    %272 = arith.subf %259, %271 : vector<1x32xf32>
    %cst_86 = arith.constant 9.99999974E-6 : f32
    %273 = vector.broadcast %cst_86 : f32 to vector<1x1xf32>
    %274 = arith.addf %270, %273 : vector<1x1xf32>
    %275 = math.rsqrt %274 : vector<1x1xf32>
    %276 = vector.broadcast %275 : vector<1x1xf32> to vector<1x32xf32>
    %277 = arith.mulf %272, %276 : vector<1x32xf32>
    %278 = arith.mulf %277, %2 : vector<1x32xf32>
    %279 = arith.addf %278, %3 : vector<1x32xf32>
    %280 = vector.broadcast %225 : vector<1x1xf32> to vector<1x32xf32>
    %281 = arith.mulf %280, %279 : vector<1x32xf32>
    %cst_87 = arith.constant 1.000000e+00 : f32
    %282 = vector.broadcast %cst_87 : f32 to vector<1x1xf32>
    %283 = arith.subf %282, %225 : vector<1x1xf32>
    %284 = vector.broadcast %283 : vector<1x1xf32> to vector<1x32xf32>
    %285 = arith.mulf %284, %222 : vector<1x32xf32>
    %286 = arith.addf %281, %285 : vector<1x32xf32>
    %287 = vector.shape_cast %286 : vector<1x32xf32> to vector<1x1x32xf32>
    %c0_88 = arith.constant 0 : index
    %c0_89 = arith.constant 0 : index
    %c0_90 = arith.constant 0 : index
    %288 = vector.load %arg18[%c0_88, %c0_89, %c0_90] : memref<1x1x32xf32, #tpu.memory_space<vmem>>, vector<1x1x32xf32>
    tpu.vector_store %arg18[%c0_88, %c0_89, %c0_90], %287 {strides = array<i32>} : memref<1x1x32xf32, #tpu.memory_space<vmem>>, vector<1x1x32xf32>,
    return
  }
  func.func @transform_0(%arg0: i32) -> (i32, i32, i32) {
    %c0_i32 = arith.constant 0 : i32
    %c0_i32_0 = arith.constant 0 : i32
    %c0_i32_1 = arith.constant 0 : i32
    return %arg0, %c0_i32, %c0_i32_0 : i32, i32, i32
  }
  func.func @transform_1(%arg0: i32) -> (i32, i32, i32) {
    %c0_i32 = arith.constant 0 : i32
    %c0_i32_0 = arith.constant 0 : i32
    %c0_i32_1 = arith.constant 0 : i32
    return %arg0, %c0_i32, %c0_i32_0 : i32, i32, i32
  }
  func.func @transform_2(%arg0: i32) -> (i32, i32) {
    %c0_i32 = arith.constant 0 : i32
    %c0_i32_0 = arith.constant 0 : i32
    %c0_i32_1 = arith.constant 0 : i32
    return %c0_i32, %c0_i32_0 : i32, i32
  }
  func.func @transform_3(%arg0: i32) -> (i32, i32) {
    %c0_i32 = arith.constant 0 : i32
    %c0_i32_0 = arith.constant 0 : i32
    %c0_i32_1 = arith.constant 0 : i32
    return %c0_i32, %c0_i32_0 : i32, i32
  }
  func.func @transform_4(%arg0: i32) -> (i32, i32) {
    %c0_i32 = arith.constant 0 : i32
    %c0_i32_0 = arith.constant 0 : i32
    %c0_i32_1 = arith.constant 0 : i32
    return %c0_i32, %c0_i32_0 : i32, i32
  }
  func.func @transform_5(%arg0: i32) -> (i32, i32) {
    %c0_i32 = arith.constant 0 : i32
    %c0_i32_0 = arith.constant 0 : i32
    %c0_i32_1 = arith.constant 0 : i32
    return %c0_i32, %c0_i32_0 : i32, i32
  }
  func.func @transform_6(%arg0: i32) -> (i32, i32) {
    %c0_i32 = arith.constant 0 : i32
    %c0_i32_0 = arith.constant 0 : i32
    %c0_i32_1 = arith.constant 0 : i32
    return %c0_i32, %c0_i32_0 : i32, i32
  }
  func.func @transform_7(%arg0: i32) -> (i32, i32) {
    %c0_i32 = arith.constant 0 : i32
    %c0_i32_0 = arith.constant 0 : i32
    %c0_i32_1 = arith.constant 0 : i32
    return %c0_i32, %c0_i32_0 : i32, i32
  }
  func.func @transform_8(%arg0: i32) -> (i32, i32) {
    %c0_i32 = arith.constant 0 : i32
    %c0_i32_0 = arith.constant 0 : i32
    %c0_i32_1 = arith.constant 0 : i32
    return %c0_i32, %c0_i32_0 : i32, i32
  }
  func.func @transform_9(%arg0: i32) -> (i32, i32) {
    %c0_i32 = arith.constant 0 : i32
    %c0_i32_0 = arith.constant 0 : i32
    %c0_i32_1 = arith.constant 0 : i32
    return %c0_i32, %c0_i32_0 : i32, i32
  }
  func.func @transform_10(%arg0: i32) -> (i32, i32) {
    %c0_i32 = arith.constant 0 : i32
    %c0_i32_0 = arith.constant 0 : i32
    %c0_i32_1 = arith.constant 0 : i32
    return %c0_i32, %c0_i32_0 : i32, i32
  }
  func.func @transform_11(%arg0: i32) -> (i32, i32) {
    %c0_i32 = arith.constant 0 : i32
    %c0_i32_0 = arith.constant 0 : i32
    %c0_i32_1 = arith.constant 0 : i32
    return %c0_i32, %c0_i32_0 : i32, i32
  }
  func.func @transform_12(%arg0: i32) -> (i32, i32) {
    %c0_i32 = arith.constant 0 : i32
    %c0_i32_0 = arith.constant 0 : i32
    %c0_i32_1 = arith.constant 0 : i32
    return %c0_i32, %c0_i32_0 : i32, i32
  }
  func.func @transform_13(%arg0: i32) -> (i32, i32) {
    %c0_i32 = arith.constant 0 : i32
    %c0_i32_0 = arith.constant 0 : i32
    %c0_i32_1 = arith.constant 0 : i32
    return %c0_i32, %c0_i32_0 : i32, i32
  }
  func.func @transform_14(%arg0: i32) -> (i32, i32) {
    %c0_i32 = arith.constant 0 : i32
    %c0_i32_0 = arith.constant 0 : i32
    %c0_i32_1 = arith.constant 0 : i32
    return %c0_i32, %c0_i32_0 : i32, i32
  }
  func.func @transform_15(%arg0: i32) -> (i32, i32) {
    %c0_i32 = arith.constant 0 : i32
    %c0_i32_0 = arith.constant 0 : i32
    %c0_i32_1 = arith.constant 0 : i32
    return %c0_i32, %c0_i32_0 : i32, i32
  }
  func.func @transform_16(%arg0: i32) -> (i32, i32) {
    %c0_i32 = arith.constant 0 : i32
    %c0_i32_0 = arith.constant 0 : i32
    %c0_i32_1 = arith.constant 0 : i32
    return %c0_i32, %c0_i32_0 : i32, i32
  }
  func.func @transform_17(%arg0: i32) -> (i32, i32, i32) {
    %c0_i32 = arith.constant 0 : i32
    %c0_i32_0 = arith.constant 0 : i32
    %c0_i32_1 = arith.constant 0 : i32
    return %arg0, %c0_i32, %c0_i32_0 : i32, i32, i32
  }
}

</mosaic_0001>

<bundles_post_ra>
// kernel: tpu_custom_call.1
= control target key start
LH: loop header
LB: loop body
LE: loop exit
PB: predicated region body
PF: predicated region fallthrough
CT: control target
= control target key end

     0   :  { %s3863_s0 = inlined_call_operand.vmem [shape: f32[2,8,32], index: 0, kind: input, shape index: {}]   ;;  %s3864_s1 = inlined_call_operand.vmem [shape: f32[2,8,1], index: 1, kind: input, shape index: {}]   ;;  %s3865_s2 = inlined_call_operand.vmem [shape: f32[32,32], index: 2, kind: input, shape index: {}]   ;;  %s3866_s3 = inlined_call_operand.vmem [shape: f32[1,32], index: 3, kind: input, shape index: {}]   ;;  %s3867_s4 = inlined_call_operand.vmem [shape: f32[1,32], index: 4, kind: input, shape index: {}]   ;;  %s3868_s5 = inlined_call_operand.vmem [shape: f32[1,32], index: 5, kind: input, shape index: {}]   ;;  %s3869_s6 = inlined_call_operand.vmem [shape: f32[32,64], index: 6, kind: input, shape index: {}]   ;;  %s3870_s7 = inlined_call_operand.vmem [shape: f32[32,64], index: 7, kind: input, shape index: {}]   ;;  %s3871_s8 = inlined_call_operand.vmem [shape: f32[1,64], index: 8, kind: input, shape index: {}]   ;;  %s3872_s9 = inlined_call_operand.vmem [shape: f32[64,32], index: 9, kind: input, shape index: {}]   ;;  %s3873_s10 = inlined_call_operand.vmem [shape: f32[64,32], index: 10, kind: input, shape index: {}]   ;;  %s3874_s11 = inlined_call_operand.vmem [shape: f32[64,32], index: 11, kind: input, shape index: {}]   ;;  %s3875_s12 = inlined_call_operand.vmem [shape: f32[64,32], index: 12, kind: input, shape index: {}]   ;;  %s3876_s13 = inlined_call_operand.vmem [shape: f32[1,32], index: 13, kind: input, shape index: {}]   ;;  %s3877_s14 = inlined_call_operand.vmem [shape: f32[1,32], index: 14, kind: input, shape index: {}]   ;;  %s3878_s15 = inlined_call_operand.vmem [shape: f32[1,32], index: 15, kind: input, shape index: {}]   ;;  %s3879_s16 = inlined_call_operand.vmem [shape: f32[1,32], index: 16, kind: input, shape index: {}]   ;;  %s3880_s17 = inlined_call_operand.hbm [shape: f32[2,1,32], index: 17, kind: output, shape index: {}]  }
   0x1   :  { %3882 = sst [smem:[#allocation7_spill]] %s3863_s0 }
   0x2   :  { %3883 = sst [smem:[#allocation8_spill]] %s3864_s1 }
   0x3   :  { %3884 = sst [smem:[#allocation9_spill]] %s3865_s2 }
   0x4   :  { %3885 = sst [smem:[#allocation10_spill]] %s3866_s3 }
   0x5   :  { %3886 = sst [smem:[#allocation11_spill]] %s3867_s4 }
   0x6   :  { %22 = vsyncpa [#allocation3], 0 }
   0x7   :  { %24 = vsyncpa [#allocation3 + $0x1], 0  ;;  %s3254_s24 = smov 0   ;;  %s3256_s25 = smov 0  }
   0x8   :  { %s3258_s26 = smov 0   ;;  %s3260_s27 = smov 0  }
   0x9 LB: > { %3887 = sst [smem:[#allocation5_spill]] %s3153_s26  ;;  %s3275_s28 = sadd.s32 4294967295, %s3157_s27   ;;  %s3157_s27 = sphi %s3260_s27, %s3900_s27   ;;  %s3153_s26 = sphi %s3258_s26, %s3897_s26   ;;  %s3149_s25 = sphi %s3256_s25, %s3899_s25   ;;  %s3145_s24 = sphi %s3254_s24, %s3898_s24  }
   0xa   : > { %s2334_s29 = sadd.s32 4294967294, %s3157_s27   ;;  %s3279_s0 = sadd.s32 1, %s3157_s27  }
   0xb   : > { %s404_s30 = sadd.s32 1, %s3153_s26  ;;  %s401_s18 = ssub.s32 %s3157_s27, %s3279_s0 }
   0xc   : > { %p414_p0 = scmp.ne.s32.totalorder %s3153_s26, %s3149_s25  ;;  %p402_p1 = scmp.eq.s32.totalorder %s401_s18, 0 }
   0xd   : > { %p415_p2 = scmp.eq.s32.totalorder %s3275_s28, 1  ;;  %p420_p3 = scmp.ne.s32.totalorder %s3149_s25, %s3145_s24 }
   0xe   : > { %p421_p4 = scmp.eq.s32.totalorder %s2334_s29, 1  ;;  %p2337_p7 = scmp.ge.s32.totalorder %s3157_s27, 1 }
   0xf   : > { %s3290_s19 = scalar_select %p402_p1, %s3153_s26, %s404_s30  }
  0x10   : > { %p3292_p5 = por %p415_p2, %p414_p0  ;;  %p3296_p6 = por %p421_p4, %p420_p3 }
  0x11   : > { %3888 = sst [smem:[#allocation6_spill]] %s3290_s19  ;;  %p498_p8 = scmp.lt.s32.totalorder %s3157_s27, 3 }
  0x13   : > { %p499_p9 = pnand %p2337_p7, %p498_p8 }
  0x14   : > { %p552_p10 = scmp.lt.s32.totalorder (!%p499_p9), %s3275_s28, 1  ;;  %s3891_s2 = sld [smem:[#allocation9_spill]] (!%p499_p9)  ;;  %v3159_v3 = vmov (!%p499_p9), 0   ;;  %v3160_v4 = vmov (!%p499_p9), 0.0|0.0   ;;  %vm3161_vm0 = vmmov (!%p499_p9), 0   ;;  %v3162_v9 = vmov (!%p499_p9), 0.0  }
  0x15   : > { %502 = sbr.rel (%p499_p9) target bundleno = 3103 (0xc1f), region = 88  ;;  %3049 = vset.pattern.permute.xlu0 (!%p499_p9), %v3159_v3  ;;  %2820 = vmatprep.subr.bf16.mxu0 (!%p499_p9), %v3160_v4  ;;  %s3892_s30 = sld [smem:[#allocation8_spill]] (!%p499_p9)  ;;  %vm626_vm1 = vcmask (!%p499_p9), 261120   ;;  %vm736_vm2 = vcmask (!%p499_p9), 1040384   ;;  %v571_v26 = vld [vmem:[%s3870_s7] sm:$0xff] (!%p499_p9)  ;;  %v572_v27 = vld [vmem:[%s3870_s7 + $0x8] sm:$0xff] (!%p499_p9)  ;;  %v715_v40 = vlaneseq (!%p499_p9) }
  0x16   : > { %2826 = vmatprep.subr.bf16.mxu1 (!%p499_p9), %v3160_v4  ;;  %3050 = vset.pattern.permute.xlu1 (!%p499_p9), %v3159_v3  ;;  %s3894_s3 = sld [smem:[#allocation10_spill]] (!%p499_p9)  ;;  %v567_v28 = vld [vmem:[%s3869_s6] sm:$0xff] (!%p499_p9)  ;;  %v3361_v29 = vpack.c.bf16 (!%p499_p9), %v572_v27, %v571_v26  ;;  %v568_v30 = vld [vmem:[%s3869_s6 + $0x8] sm:$0xff] (!%p499_p9)  ;;  %v573_v32 = vld [vmem:[%s3870_s7 + $0x10] sm:$0xff] (!%p499_p9)  ;;  %s3895_s4 = sld [smem:[#allocation11_spill]] (!%p499_p9)  ;;  %vm738_vm3 = vcmask (!%p499_p9), 1041408  }
  0x17   : > { %2523 = vmatprep.mubr.msk.f32.mxu0 (!%p499_p9), %vm3161_vm0, %v3162_v9  ;;  %2534 = vmatprep.mubr.msk.f32.mxu1 (!%p499_p9), %vm3161_vm0, %v3162_v9  ;;  %v3366_v31 = vpack.c.bf16 (!%p499_p9), %v568_v30, %v567_v28  ;;  %v574_v33 = vld [vmem:[%s3870_s7 + $0x18] sm:$0xff] (!%p499_p9)  ;;  %v569_v34 = vld [vmem:[%s3869_s6 + $0x10] sm:$0xff] (!%p499_p9)  ;;  %v716_v42 = vshrl.u32 (!%p499_p9), %v715_v40, 7  ;;  %v3402_v45 = vld [vmem:[%s3868_s5] sm:$0x1] (!%p499_p9)  ;;  %vm740_vm4 = vcmask (!%p499_p9), 1042432  }
  0x18   : > { %2828 = vmatpush3.bf16.msra.mxu1 (!%p499_p9), %v3361_v29  ;;  %v3380_v35 = vpack.c.bf16 (!%p499_p9), %v574_v33, %v573_v32  ;;  %v570_v36 = vld [vmem:[%s3869_s6 + $0x18] sm:$0xff] (!%p499_p9)  ;;  %v576_v53 = vld [vmem:[%s3872_s9] sm:$0xff] (!%p499_p9)  ;;  %v577_v54 = vld [vmem:[%s3872_s9 + $0x8] sm:$0xff] (!%p499_p9)  ;;  %vm918_vm5 = vcmask (!%p499_p9), 523264   ;;  %vm1243_vm6 = vcmask (!%p499_p9), 257024   ;;  %vm1737_vm7 = vcmask (!%p499_p9), 254976  }
  0x19   : > { %2829 = vmatprep.subr.bf16.mxu1 (!%p499_p9), %v3160_v4  ;;  %v3386_v37 = vpack.c.bf16 (!%p499_p9), %v570_v36, %v569_v34  ;;  %v3392_v43 = vsub.s32 (!%p499_p9), 0, %v716_v42  ;;  %v584_v55 = vld [vmem:[%s3873_s10] sm:$0xff] (!%p499_p9)  ;;  %v585_v56 = vld [vmem:[%s3873_s10 + $0x8] sm:$0xff] (!%p499_p9)  ;;  %v3427_v60 = vpack.c.bf16 (!%p499_p9), %v577_v54, %v576_v53  ;;  %v590_v26 = vld [vmem:[%s3873_s10 + $0x30] sm:$0xff] (!%p499_p9)  ;;  %vm2222_vm8 = vcmask (!%p499_p9), 253952   ;;  %s550_s29 = sand.u32 (!%p499_p9), 1, %s3149_s25  }
  0x1a   : > { %v560_v0 = vld [vmem:[%s3891_s2] sm:$0xff] (!%p499_p9)  ;;  %v561_v1 = vld [vmem:[%s3891_s2 + $0x8] sm:$0xff] (!%p499_p9)  ;;  %v562_v2 = vld [vmem:[%s3891_s2 + $0x10] sm:$0xff] (!%p499_p9)  ;;  %vm2252_vm9 = vcmask (!%p499_p9), 258052  }
  0x1b   : > { %v2821_v5 = vpack.c.bf16 (!%p499_p9), %v561_v1, %v560_v0  ;;  %v563_v6 = vld [vmem:[%s3891_s2 + $0x18] sm:$0xff] (!%p499_p9)  ;;  %v3410_v48 = vrot.slane (!%p499_p9), %v3402_v45, %v3392_v43  ;;  %v3431_v0 = vpack.c.bf16 (!%p499_p9), %v585_v56, %v584_v55  ;;  %v578_v1 = vld [vmem:[%s3872_s9 + $0x10] sm:$0xff] (!%p499_p9)  ;;  %v3516_v30 = vld [vmem:[%s3871_s8] sm:$0x1] (!%p499_p9)  ;;  %s3163_s2 = smov (!%p499_p9), [#allocation2]  }
  0x1c   : > { %s553_s21 = scalar_select %p552_p10, %s3275_s28, 1  ;;  %v2824_v7 = vpack.c.bf16 %v563_v6, %v562_v2  ;;  %v2340_v13 = vld [vmem:[%s3894_s3] ss:$0 sm:$0xff]  ;;  %2831 = vmatpush3.bf16.msra.mxu1 %v3380_v35  ;;  %v586_v6 = vld [vmem:[%s3873_s10 + $0x10] sm:$0xff]  ;;  %v591_v27 = vld [vmem:[%s3873_s10 + $0x38] sm:$0xff]  ;;  %v3520_v32 = vrot.slane %v3516_v30, %v3392_v43 }
  0x1d   : > { %2822 = vmatpush3.bf16.msra.mxu0 %v2821_v5  ;;  %2838 = vmatprep.subr.bf16.mxu1 %v3160_v4  ;;  %v3397_v44 = vld [vmem:[%s3895_s4] sm:$0x1]  ;;  %v579_v5 = vld [vmem:[%s3872_s9 + $0x18] sm:$0xff]  ;;  %v3507_v28 = vpack.c.bf16 %v591_v27, %v590_v26  ;;  %v602_v55 = vld [vmem:[%s3875_s12 + $0x10] sm:$0xff]  ;;  %s3099_s3 = sshll.u32 %s3163_s2, 4  ;;  %s3100_s3 = int_to_ptr.vmem [resolvable:$false] %s3099_s3 }
  0x1e   : > { %s2338_s22 = sshll.u32 %s553_s21, 3  ;;  %2823 = vmatprep.subr.bf16.mxu0 %v3160_v4  ;;  %s3893_s21 = sld [smem:[#allocation7_spill]]  ;;  %v3406_v46 = vrot.slane %v3397_v44, %v3392_v43  ;;  %v592_v36 = vld [vmem:[%s3874_s11] sm:$0xff]  ;;  %v595_v54 = vld [vmem:[%s3874_s11 + $0x18] sm:$0xff] }
  0x1f   : > { %s559_s18 = scalar_lea.vmem %s3892_s30, %s2338_s22  ;;  %v600_v42 = vld [vmem:[%s3875_s12] sm:$0xff]  ;;  %v603_v56 = vld [vmem:[%s3875_s12 + $0x18] sm:$0xff]  ;;  %s2369_s30 = sshll.u32 %s3275_s28, 4 }
  0x20   : > { %v3322_v8 = vld [vmem:[%s559_s18] sm:$0xff]  ;;  %s3101_s4 = scalar_lea.vmem %s3100_s3, 32 }
  0x21   : > { %616 = vperm.xlu0 %3049, %v3322_v8   ;;  %2825 = vmatpush3.bf16.msra.mxu0 %v2824_v7  ;;  %v749_v18 = vrot.slane %v3322_v8, 2  ;;  %v1280_v19 = vrot.slane %v3322_v8, 5  ;;  %v587_v7 = vld [vmem:[%s3873_s10 + $0x18] sm:$0xff] }
  0x22   : > { %2832 = vmatprep.subr.bf16.mxu0 %v3160_v4 }
  0x23   : > { %v3348_v20 = vsel %vm736_vm2, %v749_v18, %v1280_v19  ;;  %v589_v19 = vld [vmem:[%s3873_s10 + $0x28] sm:$0xff] }
  0x24   : > { %s555_s23 = scalar_lea.vmem %s3893_s21, %s2338_s22  ;;  %s551_s22 = scalar_lea.vmem [#allocation2], %s550_s29 }
  0x25   : > { %v613_v10 = vld [vmem:[%s555_s23] sm:$0xff]  ;;  %s2267_s18 = sshll.u32 %s551_s22, 4  ;;  %s3821_s21 = scalar_lea.hbm %s3880_s17, %s2369_s30  ;;  %s3823_s18 = int_to_ptr.vmem [resolvable:$true] %s2267_s18 }
  0x26   : > { %s2255_s23 = scalar_lea.sflag [#allocation3], %s550_s29  ;;  %s3095_s28 = scalar_lea.vmem %s3823_s18, 16 }
  0x27   : > { %p3096_p11 = scmp.ne.s32.totalorder %s3823_s18, %s3095_s28  ;;  %p3102_p0 = scmp.lt.s32.totalorder %s3823_s18, %s3100_s3 }
  0x28   : > { %p3103_p1 = scmp.lt.s32.totalorder %s3101_s4, %s3095_s28 }
  0x29   : > { %p3097_p12 = pnand %p3096_p11, %p3292_p5 }
  0x2a   : > { %p3104_p2 = por %p3103_p1, %p3102_p0 }
  0x2b   : > { %p3098_p13 = pneg %p3097_p12 }
  0x2d   : > { %p3105_p3 = pnand %p3104_p2, %p3098_p13 }
  0xa0   : > { %v3333_v11 = vpop.permute.xlu0 %616 }
  0xa1   : > { %v619_v12 = vmul.f32 %v3333_v11, %v613_v10 }
  0xa3   : > { %2524 = vmatmul.mubr.msk.f32.vlgmr.msra.gmra.mrb[0].mxu0 %vm626_vm1, %v619_v12 }
  0xa4   : > { %2545 = vmatprep.mubr.msk.f32.mxu0 %vm3161_vm0, %v3162_v9  ;;  %2834 = vmatpush3.bf16.msra.mxu0 %v3366_v31 }
  0xa5   : > { %2835 = vmatprep.subr.bf16.mxu0 %v3160_v4 }
  0xa8   : > { %2837 = vmatpush3.bf16.msra.mxu0 %v3386_v37 }
  0xa9   : > { %2850 = vmatprep.subr.bf16.mxu0 %v3160_v4 }
 0x176   : > { %v696_v14 = vpop.f32.mrb[0].mxu0 }
 0x177   : > { %v697_v15 = vadd.f32 %v2340_v13, %v696_v14  ;;  %v2525_v16 = vpop.f32.mrb[1].mxu0  ;;  %v3459_v13 = vpack.c.bf16 %v579_v5, %v578_v1  ;;  %v3461_v14 = vpack.c.bf16 %v587_v7, %v586_v6  ;;  %v599_v5 = vld [vmem:[%s3874_s11 + $0x38] sm:$0xff]  ;;  %v606_v6 = vld [vmem:[%s3875_s12 + $0x30] sm:$0xff] }
 0x178   : > { %v581_v16 = vld [vmem:[%s3872_s9 + $0x28] sm:$0xff]  ;;  %v607_v7 = vld [vmem:[%s3875_s12 + $0x38] sm:$0xff] }
 0x179   : > { %v700_v17 = vsel %vm626_vm1, %v697_v15, 0.0 }
 0x17a   : > { %701 = vadd.xlane.f32.xlu0 %v700_v17  ;;  %v588_v17 = vld [vmem:[%s3873_s10 + $0x20] sm:$0xff] }
 0x190   : > { %1755 = vperm.xlu0 %3049, %v3348_v20  }
 0x207   : > { %v702_v21 = vpop.xlane.xlu0 %701 }
 0x208   : > { %v704_v22 = vmul.f32 0.03125, %v702_v21 }
 0x20a   : > { %v705_v23 = vsub.f32 %v697_v15, %v704_v22  ;;  %v580_v15 = vld [vmem:[%s3872_s9 + $0x20] sm:$0xff]  ;;  %v3485_v22 = vpack.c.bf16 %v589_v19, %v588_v17 }
 0x20b   : > { %v3483_v21 = vpack.c.bf16 %v581_v16, %v580_v15  ;;  %v3601_v16 = vpack.c.bf16 %v607_v7, %v606_v6  ;;  %v3626_v17 = vld [vmem:[%s3876_s13] sm:$0x1] }
 0x20c   : > { %v706_v24 = vmul.f32 %v705_v23, %v705_v23  ;;  %v3631_v19 = vld [vmem:[%s3877_s14] sm:$0x1] }
 0x20e   : > { %v707_v25 = vsel %vm626_vm1, %v706_v24, 0.0  ;;  %v583_v24 = vld [vmem:[%s3872_s9 + $0x38] sm:$0xff] }
 0x20f   : > { %708 = vadd.xlane.f32.xlu1 %v707_v25 }
 0x29c   : > { %v709_v38 = vpop.xlane.xlu1 %708 }
 0x29d   : > { %v710_v39 = vmul.f32 0.03125, %v709_v38 }
 0x29f   : > { %v711_v41 = vadd.f32 1e-05, %v710_v39 }
 0x2a1   : > { %3051 = vrsqrt.f32 %v711_v41  ;;  %v593_v41 = vld [vmem:[%s3874_s11 + $0x8] sm:$0xff] }
 0x2ab   : > { %v3052_v47 = vpop.eup %3051 }
 0x2ac   : > { %v713_v49 = vmul.f32 %v3052_v47, %v705_v23  ;;  %v582_v23 = vld [vmem:[%s3872_s9 + $0x30] sm:$0xff]  ;;  %v601_v47 = vld [vmem:[%s3875_s12 + $0x8] sm:$0xff] }
 0x2ad   : > { %v3499_v25 = vpack.c.bf16 %v583_v24, %v582_v23  ;;  %v3635_v23 = vrot.slane %v3626_v17, %v3392_v43  ;;  %v3639_v24 = vrot.slane %v3631_v19, %v3392_v43 }
 0x2ae   : > { %v720_v50 = vmul.f32 %v3406_v46, %v713_v49 }
 0x2b0   : > { %v727_v51 = vadd.f32 %v3410_v48, %v720_v50  ;;  %v3535_v50 = vpack.c.bf16 %v593_v41, %v592_v36  ;;  %v3646_v41 = vld [vmem:[%s3878_s15] sm:$0x1] }
 0x2b2   : > { %v728_v52 = vmul.f32 %v727_v51, %v3333_v11  ;;  %v3537_v51 = vpack.c.bf16 %v601_v47, %v600_v42  ;;  %v3650_v42 = vrot.slane %v3646_v41, %v3392_v43 }
 0x2b4   : > { %v730_v57 = vrot.slane %v728_v52, 1  ;;  %v732_v58 = vrot.slane %v728_v52, 2  ;;  %v734_v59 = vrot.slane %v728_v52, 3  ;;  %v742_v61 = vrot.slane %v728_v52, 4 }
 0x2b6   : > { %v744_v62 = vsel %vm736_vm2, %v730_v57, %v732_v58  ;;  %v737_v63 = vsel %vm736_vm2, %v728_v52, %v730_v57  ;;  %v594_v52 = vld [vmem:[%s3874_s11 + $0x10] sm:$0xff] }
 0x2b7   : > { %v745_v2 = vsel %vm738_vm3, %v744_v62, %v734_v59  ;;  %v739_v3 = vsel %vm738_vm3, %v737_v63, %v732_v58  ;;  %v3555_v57 = vpack.c.bf16 %v595_v54, %v594_v52  ;;  %v3557_v58 = vpack.c.bf16 %v603_v56, %v602_v55  ;;  %v604_v62 = vld [vmem:[%s3875_s12 + $0x20] sm:$0xff]  ;;  %v605_v63 = vld [vmem:[%s3875_s12 + $0x28] sm:$0xff] }
 0x2b8   : > { %v3448_v10 = vsel %vm740_vm4, %v745_v2, %v742_v61  ;;  %v3451_v12 = vsel %vm740_vm4, %v739_v3, %v734_v59  ;;  %v596_v59 = vld [vmem:[%s3874_s11 + $0x20] sm:$0xff]  ;;  %v597_v61 = vld [vmem:[%s3874_s11 + $0x28] sm:$0xff]  ;;  %v3581_v2 = vpack.c.bf16 %v605_v63, %v604_v62  ;;  %v598_v3 = vld [vmem:[%s3874_s11 + $0x30] sm:$0xff] }
 0x2b9   : > { %2535 = vmatmul.mubr.msk.f32.vlgmr.msra.gmra.mrb[0].mxu1 %vm626_vm1, %v3448_v10  ;;  %2546 = vmatmul.mubr.msk.f32.vlgmr.msra.gmra.mrb[2].mxu0 %vm626_vm1, %v3451_v12  ;;  %v3579_v1 = vpack.c.bf16 %v597_v61, %v596_v59  ;;  %v3599_v15 = vpack.c.bf16 %v599_v5, %v598_v3 }
 0x2ba   : > { %2840 = vmatpush3.bf16.msra.mxu1 %v3427_v60  ;;  %2852 = vmatpush3.bf16.msra.mxu0 %v3431_v0 }
 0x2bb   : > { %2841 = vmatprep.subr.bf16.mxu1 %v3160_v4  ;;  %2853 = vmatprep.subr.bf16.mxu0 %v3160_v4 }
 0x2bc   : > { %2564 = vmatprep.mubr.msk.f32.mxu1 %vm3161_vm0, %v3162_v9  ;;  %2583 = vmatprep.mubr.msk.f32.mxu0 %vm3161_vm0, %v3162_v9 }
 0x2be   : > { %2843 = vmatpush3.bf16.msra.mxu1 %v3459_v13  ;;  %2855 = vmatpush3.bf16.msra.mxu0 %v3461_v14 }
 0x2bf   : > { %2844 = vmatprep.subr.bf16.mxu1 %v3160_v4  ;;  %2856 = vmatprep.subr.bf16.mxu0 %v3160_v4 }
 0x2c2   : > { %2846 = vmatpush3.bf16.msra.mxu1 %v3483_v21  ;;  %2858 = vmatpush3.bf16.msra.mxu0 %v3485_v22 }
 0x2c3   : > { %2847 = vmatprep.subr.bf16.mxu1 %v3160_v4  ;;  %2859 = vmatprep.subr.bf16.mxu0 %v3160_v4 }
 0x2c6   : > { %2849 = vmatpush3.bf16.msra.mxu1 %v3499_v25  ;;  %2861 = vmatpush3.bf16.msra.mxu0 %v3507_v28 }
 0x2c7   : > { %2862 = vmatprep.subr.bf16.mxu1 %v3160_v4  ;;  %2874 = vmatprep.subr.bf16.mxu0 %v3160_v4 }
 0x38c   : > { %v827_v33 = vpop.f32.mrb[0].mxu1  ;;  %v900_v34 = vpop.f32.mrb[2].mxu0 }
 0x38d   : > { %v901_v38 = vadd.f32 %v900_v34, %v827_v33  ;;  %v2536_v39 = vpop.f32.mrb[1].mxu1  ;;  %v2547_v40 = vpop.f32.mrb[3].mxu0 }
 0x38f   : > { %v910_v49 = vadd.f32 %v3520_v32, %v901_v38 }
 0x391   : > { %v911_v53 = vmax.f32 %v910_v49, 0.0 }
 0x393   : > { %2565 = vmatmul.mubr.msk.f32.vlgmr.msra.gmra.mrb[2].mxu1 %vm918_vm5, %v911_v53  ;;  %2584 = vmatmul.mubr.msk.f32.vlgmr.msra.gmra.mrb[4].mxu0 %vm918_vm5, %v911_v53 }
 0x394   : > { %2864 = vmatpush3.bf16.msra.mxu1 %v3535_v50  ;;  %2876 = vmatpush3.bf16.msra.mxu0 %v3537_v51 }
 0x395   : > { %2865 = vmatprep.subr.bf16.mxu1 %v3160_v4  ;;  %2877 = vmatprep.subr.bf16.mxu0 %v3160_v4 }
 0x396   : > { %2602 = vmatprep.mubr.msk.f32.mxu1 %vm3161_vm0, %v3162_v9  ;;  %2621 = vmatprep.mubr.msk.f32.mxu0 %vm3161_vm0, %v3162_v9 }
 0x398   : > { %2867 = vmatpush3.bf16.msra.mxu1 %v3555_v57  ;;  %2879 = vmatpush3.bf16.msra.mxu0 %v3557_v58 }
 0x399   : > { %2868 = vmatprep.subr.bf16.mxu1 %v3160_v4  ;;  %2880 = vmatprep.subr.bf16.mxu0 %v3160_v4 }
 0x39c   : > { %2870 = vmatpush3.bf16.msra.mxu1 %v3579_v1  ;;  %2882 = vmatpush3.bf16.msra.mxu0 %v3581_v2 }
 0x39d   : > { %2871 = vmatprep.subr.bf16.mxu1 %v3160_v4  ;;  %2883 = vmatprep.subr.bf16.mxu0 %v3160_v4 }
 0x3a0   : > { %2873 = vmatpush3.bf16.msra.mxu1 %v3599_v15  ;;  %2885 = vmatpush3.bf16.msra.mxu0 %v3601_v16 }
 0x3a1   : > { %2886 = vmatprep.subr.bf16.mxu1 %v3160_v4  ;;  %2892 = vmatprep.subr.bf16.mxu0 %v3160_v4 }
 0x3a3   : > { %2603 = vmatmul.mubr.msk.f32.vlgmr.msra.gmra.mrb[4].mxu1 %vm918_vm5, %v911_v53  ;;  %2622 = vmatmul.mubr.msk.f32.vlgmr.msra.gmra.mrb[6].mxu0 %vm918_vm5, %v911_v53 }
 0x3a4   : > { %2888 = vmatpush3.bf16.msra.mxu1 %v3361_v29  ;;  %2894 = vmatpush3.bf16.msra.mxu0 %v3366_v31 }
 0x3a5   : > { %2889 = vmatprep.subr.bf16.mxu1 %v3160_v4  ;;  %2895 = vmatprep.subr.bf16.mxu0 %v3160_v4 }
 0x3a6   : > { %2632 = vmatprep.mubr.msk.f32.mxu1 %vm3161_vm0, %v3162_v9  ;;  %2643 = vmatprep.mubr.msk.f32.mxu0 %vm3161_vm0, %v3162_v9 }
 0x3a8   : > { %2891 = vmatpush3.bf16.msra.mxu1 %v3380_v35  ;;  %2897 = vmatpush3.bf16.msra.mxu0 %v3386_v37 }
 0x3a9   : > { %2898 = vmatprep.subr.bf16.mxu1 %v3160_v4  ;;  %2910 = vmatprep.subr.bf16.mxu0 %v3160_v4 }
 0x466   : > { %v988_v26 = vpop.f32.mrb[2].mxu1  ;;  %v1070_v27 = vpop.f32.mrb[4].mxu0 }
 0x467   : > { %v989_v33 = vadd.f32 %v988_v26, %v3635_v23  ;;  %v1071_v34 = vadd.f32 %v1070_v27, %v3639_v24  ;;  %v2566_v36 = vpop.f32.mrb[3].mxu1  ;;  %v2585_v38 = vpop.f32.mrb[5].mxu0 }
 0x469   : > { %v2345_v39 = vmul.f32 -1.442695, %v989_v33  ;;  %v2347_v40 = vmul.f32 -1.442695, %v1071_v34  ;;  %v3658_v33 = vld [vmem:[%s3879_s16] sm:$0x1] }
 0x46a   : > { %v3662_v34 = vrot.slane %v3658_v33, %v3392_v43 }
 0x46b   : > { %3053 = vpow2.f32 %v2345_v39 }
 0x46c   : > { %3055 = vpow2.f32 %v2347_v40 }
 0x475   : > { %v3054_v47 = vpop.eup %3053 }
 0x476   : > { %v3056_v49 = vpop.eup %3055  ;;  %v995_v52 = vadd.f32 1.0, %v3054_v47  ;;  %v1152_v53 = vpop.f32.mrb[4].mxu1  ;;  %v747_v47 = vrot.slane %v3322_v8, 1 }
 0x477   : > { %v1234_v54 = vpop.f32.mrb[6].mxu0  ;;  %v1077_v55 = vadd.f32 1.0, %v3056_v49  ;;  %v1153_v56 = vadd.f32 %v1152_v53, %v3650_v42  ;;  %v2604_v59 = vpop.f32.mrb[5].mxu1  ;;  %v751_v49 = vrot.slane %v3322_v8, 3  ;;  %v753_v53 = vrot.slane %v3322_v8, 4 }
 0x478   : > { %v2623_v61 = vpop.f32.mrb[7].mxu0  ;;  %3057 = vrcp.f32 %v995_v52  ;;  %v1235_v36 = vadd.f32 %v1234_v54, %v3662_v34  ;;  %v755_v52 = vsel %vm736_vm2, %v747_v47, %v749_v18 }
 0x479   : > { %3059 = vrcp.f32 %v1077_v55  ;;  %v2349_v62 = vmul.f32 -1.442695, %v1153_v56  ;;  %v756_v43 = vsel %vm738_vm3, %v755_v52, %v751_v49 }
 0x47a   : > { %v757_v54 = vsel %vm740_vm4, %v756_v43, %v753_v53 }
 0x47b   : > { %3061 = vpow2.f32 %v2349_v62 }
 0x482   : > { %v3058_v63 = vpop.eup %3057 }
 0x483   : > { %v3060_v3 = vpop.eup %3059  ;;  %v1238_v5 = vmul.f32 %v3058_v63, %v3451_v12  ;;  %v1265_v63 = vsub.f32 1.0, %v757_v54 }
 0x484   : > { %v1239_v6 = vmul.f32 %v3060_v3, %v3448_v10 }
 0x485   : > { %v3062_v7 = vpop.eup %3061 }
 0x486   : > { %v1159_v26 = vadd.f32 1.0, %v3062_v7  ;;  %v1240_v27 = vadd.f32 %v1239_v6, %v1238_v5 }
 0x488   : > { %3063 = vrcp.f32 %v1159_v26 }
 0x492   : > { %v3064_v38 = vpop.eup %3063 }
 0x493   : > { %v1241_v39 = vmul.f32 %v3064_v38, %v1235_v36 }
 0x495   : > { %v1242_v40 = vadd.f32 %v1241_v39, %v1240_v27 }
 0x497   : > { %v1244_v10 = vsel %vm1243_vm6, %v1242_v40, 0.0 }
 0x498   : > { %1245 = vadd.xlane.f32.xlu1 %v1244_v10 }
 0x4a9   : > { %1261 = vperm.xlu1 %3050, %v757_v54  }
 0x525   : > { %v1246_v55 = vpop.xlane.xlu1 %1245 }
 0x526   : > { %v1247_v56 = vmul.f32 0.03125, %v1246_v55 }
 0x528   : > { %v1248_v59 = vsub.f32 %v1242_v40, %v1247_v56 }
 0x529   : > { %v1262_v3 = vpop.permute.xlu1 %1261 }
 0x52a   : > { %v1249_v61 = vmul.f32 %v1248_v59, %v1248_v59 }
 0x52c   : > { %v1250_v62 = vsel %vm1243_vm6, %v1249_v61, 0.0 }
 0x52d   : > { %1251 = vadd.xlane.f32.xlu1 %v1250_v62 }
 0x53e   : > { %1268 = vperm.xlu1 %3050, %v1265_v63  }
 0x5ba   : > { %v1252_v5 = vpop.xlane.xlu1 %1251 }
 0x5bb   : > { %v1253_v6 = vmul.f32 0.03125, %v1252_v5 }
 0x5bd   : > { %v1254_v7 = vadd.f32 1e-05, %v1253_v6 }
 0x5be   : > { %v1269_v36 = vpop.permute.xlu1 %1268 }
 0x5bf   : > { %3065 = vrsqrt.f32 %v1254_v7  ;;  %v1271_v40 = vmul.f32 %v1269_v36, %v3451_v12 }
 0x5c9   : > { %v3066_v18 = vpop.eup %3065 }
 0x5ca   : > { %v1256_v26 = vmul.f32 %v3066_v18, %v1248_v59 }
 0x5cc   : > { %v1257_v27 = vmul.f32 %v1256_v26, %v3406_v46 }
 0x5ce   : > { %v1258_v38 = vadd.f32 %v1257_v27, %v3410_v48 }
 0x5d0   : > { %v1264_v39 = vmul.f32 %v1262_v3, %v1258_v38 }
 0x5d2   : > { %v1272_v10 = vadd.f32 %v1271_v40, %v1264_v39 }
 0x5d4   : > { %v1274_v47 = vrot.slane %v1272_v10, 1  ;;  %v1277_v49 = vrot.slane %v1272_v10, 2 }
 0x5d6   : > { %v3677_v52 = vsel %vm736_vm2, %v1274_v47, %v1277_v49  ;;  %v3680_v53 = vsel %vm736_vm2, %v1272_v10, %v1274_v47 }
 0x5d7   : > { %2633 = vmatmul.mubr.msk.f32.vlgmr.msra.gmra.mrb[6].mxu1 %vm626_vm1, %v3677_v52  ;;  %2644 = vmatmul.mubr.msk.f32.vlgmr.msra.gmra.mrb[8].mxu0 %vm626_vm1, %v3680_v53 }
 0x5d8   : > { %2900 = vmatpush3.bf16.msra.mxu1 %v3427_v60  ;;  %2912 = vmatpush3.bf16.msra.mxu0 %v3431_v0 }
 0x5d9   : > { %2901 = vmatprep.subr.bf16.mxu1 %v3160_v4  ;;  %2913 = vmatprep.subr.bf16.mxu0 %v3160_v4 }
 0x5da   : > { %2662 = vmatprep.mubr.msk.f32.mxu1 %vm3161_vm0, %v3162_v9  ;;  %2681 = vmatprep.mubr.msk.f32.mxu0 %vm3161_vm0, %v3162_v9 }
 0x5dc   : > { %2903 = vmatpush3.bf16.msra.mxu1 %v3459_v13  ;;  %2915 = vmatpush3.bf16.msra.mxu0 %v3461_v14 }
 0x5dd   : > { %2904 = vmatprep.subr.bf16.mxu1 %v3160_v4  ;;  %2916 = vmatprep.subr.bf16.mxu0 %v3160_v4 }
 0x5e0   : > { %2906 = vmatpush3.bf16.msra.mxu1 %v3483_v21  ;;  %2918 = vmatpush3.bf16.msra.mxu0 %v3485_v22 }
 0x5e1   : > { %2907 = vmatprep.subr.bf16.mxu1 %v3160_v4  ;;  %2919 = vmatprep.subr.bf16.mxu0 %v3160_v4 }
 0x5e4   : > { %2909 = vmatpush3.bf16.msra.mxu1 %v3499_v25  ;;  %2921 = vmatpush3.bf16.msra.mxu0 %v3507_v28 }
 0x5e5   : > { %2922 = vmatprep.subr.bf16.mxu1 %v3160_v4  ;;  %2934 = vmatprep.subr.bf16.mxu0 %v3160_v4 }
 0x6aa   : > { %v1352_v12 = vpop.f32.mrb[6].mxu1  ;;  %v1425_v43 = vpop.f32.mrb[8].mxu0 }
 0x6ab   : > { %v1426_v54 = vadd.f32 %v1425_v43, %v1352_v12  ;;  %v2634_v55 = vpop.f32.mrb[7].mxu1  ;;  %v2645_v56 = vpop.f32.mrb[9].mxu0 }
 0x6ad   : > { %v1429_v59 = vadd.f32 %v1426_v54, %v3520_v32 }
 0x6af   : > { %v1430_v61 = vmax.f32 %v1429_v59, 0.0 }
 0x6b1   : > { %2663 = vmatmul.mubr.msk.f32.vlgmr.msra.gmra.mrb[8].mxu1 %vm918_vm5, %v1430_v61  ;;  %2682 = vmatmul.mubr.msk.f32.vlgmr.msra.gmra.mrb[10].mxu0 %vm918_vm5, %v1430_v61 }
 0x6b2   : > { %2924 = vmatpush3.bf16.msra.mxu1 %v3535_v50  ;;  %2936 = vmatpush3.bf16.msra.mxu0 %v3537_v51 }
 0x6b3   : > { %2925 = vmatprep.subr.bf16.mxu1 %v3160_v4  ;;  %2937 = vmatprep.subr.bf16.mxu0 %v3160_v4 }
 0x6b4   : > { %2700 = vmatprep.mubr.msk.f32.mxu1 %vm3161_vm0, %v3162_v9  ;;  %2719 = vmatprep.mubr.msk.f32.mxu0 %vm3161_vm0, %v3162_v9 }
 0x6b6   : > { %2927 = vmatpush3.bf16.msra.mxu1 %v3555_v57  ;;  %2939 = vmatpush3.bf16.msra.mxu0 %v3557_v58 }
 0x6b7   : > { %2928 = vmatprep.subr.bf16.mxu1 %v3160_v4  ;;  %2940 = vmatprep.subr.bf16.mxu0 %v3160_v4 }
 0x6ba   : > { %2930 = vmatpush3.bf16.msra.mxu1 %v3579_v1  ;;  %2942 = vmatpush3.bf16.msra.mxu0 %v3581_v2 }
 0x6bb   : > { %2931 = vmatprep.subr.bf16.mxu1 %v3160_v4  ;;  %2943 = vmatprep.subr.bf16.mxu0 %v3160_v4 }
 0x6be   : > { %2933 = vmatpush3.bf16.msra.mxu1 %v3599_v15  ;;  %2945 = vmatpush3.bf16.msra.mxu0 %v3601_v16 }
 0x6bf   : > { %2952 = vmatprep.subr.bf16.mxu0 %v3160_v4  ;;  %2946 = vmatprep.subr.bf16.mxu1 %v3160_v4 }
 0x6c1   : > { %2701 = vmatmul.mubr.msk.f32.vlgmr.msra.gmra.mrb[10].mxu1 %vm918_vm5, %v1430_v61  ;;  %2720 = vmatmul.mubr.msk.f32.vlgmr.msra.gmra.mrb[12].mxu0 %vm918_vm5, %v1430_v61 }
 0x6c2   : > { %2954 = vmatpush3.bf16.msra.mxu0 %v3366_v31  ;;  %2948 = vmatpush3.bf16.msra.mxu1 %v3361_v29 }
 0x6c3   : > { %2955 = vmatprep.subr.bf16.mxu0 %v3160_v4  ;;  %2949 = vmatprep.subr.bf16.mxu1 %v3160_v4 }
 0x6c4   : > { %2741 = vmatprep.mubr.msk.f32.mxu0 %vm3161_vm0, %v3162_v9  ;;  %2730 = vmatprep.mubr.msk.f32.mxu1 %vm3161_vm0, %v3162_v9 }
 0x6c6   : > { %2957 = vmatpush3.bf16.msra.mxu0 %v3386_v37  ;;  %2951 = vmatpush3.bf16.msra.mxu1 %v3380_v35 }
 0x6c7   : > { %2958 = vmatprep.subr.bf16.mxu1 %v3160_v4  ;;  %2970 = vmatprep.subr.bf16.mxu0 %v3160_v4 }
 0x784   : > { %v1500_v31 = vpop.f32.mrb[8].mxu1  ;;  %v1576_v29 = vpop.f32.mrb[10].mxu0 }
 0x785   : > { %v1501_v32 = vadd.f32 %v1500_v31, %v3635_v23  ;;  %v1577_v62 = vadd.f32 %v1576_v29, %v3639_v24  ;;  %v2664_v63 = vpop.f32.mrb[9].mxu1  ;;  %v2683_v3 = vpop.f32.mrb[11].mxu0 }
 0x786   : > { %v1756_v63 = vpop.permute.xlu0 %1755 }
 0x787   : > { %v2354_v5 = vmul.f32 -1.442695, %v1501_v32  ;;  %v2356_v6 = vmul.f32 -1.442695, %v1577_v62 }
 0x789   : > { %3067 = vpow2.f32 %v2354_v5 }
 0x78a   : > { %3069 = vpow2.f32 %v2356_v6 }
 0x793   : > { %v3068_v7 = vpop.eup %3067 }
 0x794   : > { %v3070_v37 = vpop.eup %3069  ;;  %v1507_v18 = vadd.f32 1.0, %v3068_v7  ;;  %v1652_v35 = vpop.f32.mrb[10].mxu1 }
 0x795   : > { %v1728_v26 = vpop.f32.mrb[12].mxu0  ;;  %v1583_v27 = vadd.f32 1.0, %v3070_v37  ;;  %v1653_v36 = vadd.f32 %v1652_v35, %v3650_v42  ;;  %v2702_v38 = vpop.f32.mrb[11].mxu1 }
 0x796   : > { %v2721_v39 = vpop.f32.mrb[13].mxu0  ;;  %3071 = vrcp.f32 %v1507_v18  ;;  %v1729_v54 = vadd.f32 %v1728_v26, %v3662_v34 }
 0x797   : > { %3073 = vrcp.f32 %v1583_v27  ;;  %v2358_v23 = vmul.f32 -1.442695, %v1653_v36 }
 0x799   : > { %3075 = vpow2.f32 %v2358_v23 }
 0x7a0   : > { %v3072_v24 = vpop.eup %3071 }
 0x7a1   : > { %v3074_v40 = vpop.eup %3073  ;;  %v1732_v10 = vmul.f32 %v3072_v24, %v3680_v53 }
 0x7a2   : > { %v1733_v47 = vmul.f32 %v3074_v40, %v3677_v52  ;;  %v1759_v52 = vsub.f32 1.0, %v3348_v20 }
 0x7a3   : > { %v3076_v49 = vpop.eup %3075 }
 0x7a4   : > { %v1659_v12 = vadd.f32 1.0, %v3076_v49  ;;  %v1734_v43 = vadd.f32 %v1733_v47, %v1732_v10 }
 0x7a6   : > { %3077 = vrcp.f32 %v1659_v12 }
 0x7b0   : > { %v3078_v55 = vpop.eup %3077 }
 0x7b1   : > { %v1735_v42 = vmul.f32 %v3078_v55, %v1729_v54 }
 0x7b3   : > { %v1736_v56 = vadd.f32 %v1735_v42, %v1734_v43 }
 0x7b5   : > { %v1738_v59 = vsel %vm1737_vm7, %v1736_v56, 0.0 }
 0x7b6   : > { %1739 = vadd.xlane.f32.xlu1 %v1738_v59 }
 0x843   : > { %v1740_v61 = vpop.xlane.xlu1 %1739 }
 0x844   : > { %v1741_v31 = vmul.f32 0.03125, %v1740_v61 }
 0x846   : > { %v1742_v29 = vsub.f32 %v1736_v56, %v1741_v31 }
 0x848   : > { %v1743_v32 = vmul.f32 %v1742_v29, %v1742_v29 }
 0x84a   : > { %v1744_v62 = vsel %vm1737_vm7, %v1743_v32, 0.0 }
 0x84b   : > { %1745 = vadd.xlane.f32.xlu0 %v1744_v62 }
 0x861   : > { %1762 = vperm.xlu0 %3049, %v1759_v52  }
 0x8d8   : > { %v1746_v3 = vpop.xlane.xlu0 %1745 }
 0x8d9   : > { %v1747_v5 = vmul.f32 0.03125, %v1746_v3 }
 0x8db   : > { %v1748_v6 = vadd.f32 1e-05, %v1747_v5 }
 0x8dd   : > { %3079 = vrsqrt.f32 %v1748_v6 }
 0x8e0   : > { %v1763_v18 = vpop.permute.xlu0 %1762 }
 0x8e1   : > { %v1765_v27 = vmul.f32 %v1763_v18, %v3680_v53 }
 0x8e7   : > { %v3080_v34 = vpop.eup %3079 }
 0x8e8   : > { %v1750_v7 = vmul.f32 %v3080_v34, %v1742_v29  ;;  %v2242_v29 = vsub.f32 1.0, %v3322_v8 }
 0x8ea   : > { %v1751_v37 = vmul.f32 %v1750_v7, %v3406_v46 }
 0x8ec   : > { %v1752_v35 = vadd.f32 %v1751_v37, %v3410_v48 }
 0x8ee   : > { %v1758_v26 = vmul.f32 %v1756_v63, %v1752_v35 }
 0x8f0   : > { %v3753_v36 = vadd.f32 %v1765_v27, %v1758_v26 }
 0x8f2   : > { %v1768_v20 = vrot.slane %v3753_v36, 1  ;;  %2742 = vmatmul.mubr.msk.f32.vlgmr.msra.gmra.mrb[14].mxu0 %vm626_vm1, %v3753_v36  ;;  %v2248_v7 = vrot.slane %v3753_v36, 4 }
 0x8f3   : > { %2972 = vmatpush3.bf16.msra.mxu0 %v3431_v0  ;;  %2779 = vmatprep.mubr.msk.f32.mxu0 %vm3161_vm0, %v3162_v9 }
 0x8f4   : > { %2731 = vmatmul.mubr.msk.f32.vlgmr.msra.gmra.mrb[12].mxu1 %vm626_vm1, %v1768_v20  ;;  %2973 = vmatprep.subr.bf16.mxu0 %v3160_v4 }
 0x8f5   : > { %2960 = vmatpush3.bf16.msra.mxu1 %v3427_v60  ;;  %2760 = vmatprep.mubr.msk.f32.mxu1 %vm3161_vm0, %v3162_v9 }
 0x8f6   : > { %2961 = vmatprep.subr.bf16.mxu1 %v3160_v4 }
 0x8f7   : > { %2975 = vmatpush3.bf16.msra.mxu0 %v3461_v14 }
 0x8f8   : > { %2976 = vmatprep.subr.bf16.mxu0 %v3160_v4 }
 0x8f9   : > { %2963 = vmatpush3.bf16.msra.mxu1 %v3459_v13 }
 0x8fa   : > { %2964 = vmatprep.subr.bf16.mxu1 %v3160_v4 }
 0x8fb   : > { %2978 = vmatpush3.bf16.msra.mxu0 %v3485_v22 }
 0x8fc   : > { %2979 = vmatprep.subr.bf16.mxu0 %v3160_v4 }
 0x8fd   : > { %2966 = vmatpush3.bf16.msra.mxu1 %v3483_v21 }
 0x8fe   : > { %2967 = vmatprep.subr.bf16.mxu1 %v3160_v4 }
 0x8ff   : > { %2981 = vmatpush3.bf16.msra.mxu0 %v3507_v28 }
 0x900   : > { %2994 = vmatprep.subr.bf16.mxu0 %v3160_v4 }
 0x901   : > { %2969 = vmatpush3.bf16.msra.mxu1 %v3499_v25 }
 0x902   : > { %2982 = vmatprep.subr.bf16.mxu1 %v3160_v4 }
 0x9c5   : > { %v1909_v46 = vpop.f32.mrb[14].mxu0 }
 0x9c6   : > { %v2743_v48 = vpop.f32.mrb[15].mxu0 }
 0x9c7   : > { %v1837_v60 = vpop.f32.mrb[12].mxu1 }
 0x9c8   : > { %v1910_v0 = vadd.f32 %v1909_v46, %v1837_v60  ;;  %v2732_v13 = vpop.f32.mrb[13].mxu1 }
 0x9ca   : > { %v1913_v14 = vadd.f32 %v1910_v0, %v3516_v30 }
 0x9cc   : > { %v1914_v22 = vmax.f32 %v1913_v14, 0.0 }
 0x9ce   : > { %2761 = vmatmul.mubr.msk.f32.vlgmr.msra.gmra.mrb[14].mxu1 %vm918_vm5, %v1914_v22  ;;  %2780 = vmatmul.mubr.msk.f32.vlgmr.msra.gmra.mrb[16].mxu0 %vm918_vm5, %v1914_v22 }
 0x9cf   : > { %2984 = vmatpush3.bf16.msra.mxu1 %v3535_v50  ;;  %2996 = vmatpush3.bf16.msra.mxu0 %v3537_v51 }
 0x9d0   : > { %2985 = vmatprep.subr.bf16.mxu1 %v3160_v4  ;;  %2997 = vmatprep.subr.bf16.mxu0 %v3160_v4 }
 0x9d1   : > { %2798 = vmatprep.mubr.msk.f32.mxu1 %vm3161_vm0, %v3162_v9  ;;  %2817 = vmatprep.mubr.msk.f32.mxu0 %vm3161_vm0, %v3162_v9 }
 0x9d3   : > { %2987 = vmatpush3.bf16.msra.mxu1 %v3555_v57  ;;  %2999 = vmatpush3.bf16.msra.mxu0 %v3557_v58 }
 0x9d4   : > { %2988 = vmatprep.subr.bf16.mxu1 %v3160_v4  ;;  %3000 = vmatprep.subr.bf16.mxu0 %v3160_v4 }
 0x9d7   : > { %2990 = vmatpush3.bf16.msra.mxu1 %v3579_v1  ;;  %3002 = vmatpush3.bf16.msra.mxu0 %v3581_v2 }
 0x9d8   : > { %2991 = vmatprep.subr.bf16.mxu1 %v3160_v4  ;;  %3003 = vmatprep.subr.bf16.mxu0 %v3160_v4 }
 0x9db   : > { %2993 = vmatpush3.bf16.msra.mxu1 %v3599_v15  ;;  %3005 = vmatpush3.bf16.msra.mxu0 %v3601_v16 }
 0x9de   : > { %2799 = vmatmul.mubr.msk.f32.vlgmr.msra.gmra.mrb[16].mxu1 %vm918_vm5, %v1914_v22  ;;  %2818 = vmatmul.mubr.msk.f32.vlgmr.msra.gmra.mrb[18].mxu0 %vm918_vm5, %v1914_v22 }
 0xaa1   : > { %v1984_v9 = vpop.f32.mrb[14].mxu1  ;;  %v2060_v21 = vpop.f32.mrb[16].mxu0 }
 0xaa2   : > { %v1985_v25 = vadd.f32 %v1984_v9, %v3626_v17  ;;  %v2061_v28 = vadd.f32 %v2060_v21, %v3631_v19  ;;  %v2762_v30 = vpop.f32.mrb[15].mxu1  ;;  %v2781_v50 = vpop.f32.mrb[17].mxu0 }
 0xaa4   : > { %v2363_v51 = vmul.f32 -1.442695, %v1985_v25  ;;  %v2365_v57 = vmul.f32 -1.442695, %v2061_v28 }
 0xaa6   : > { %3081 = vpow2.f32 %v2363_v51 }
 0xaa7   : > { %3083 = vpow2.f32 %v2365_v57 }
 0xab0   : > { %v3082_v4 = vpop.eup %3081 }
 0xab1   : > { %v3084_v58 = vpop.eup %3083  ;;  %v1991_v1 = vadd.f32 1.0, %v3082_v4  ;;  %v2136_v2 = vpop.f32.mrb[16].mxu1 }
 0xab2   : > { %v2212_v15 = vpop.f32.mrb[18].mxu0  ;;  %v2067_v16 = vadd.f32 1.0, %v3084_v58  ;;  %v2137_v53 = vadd.f32 %v2136_v2, %v3646_v41  ;;  %v2800_v38 = vpop.f32.mrb[17].mxu1 }
 0xab3   : > { %v2819_v39 = vpop.f32.mrb[19].mxu0  ;;  %3085 = vrcp.f32 %v1991_v1  ;;  %v2213_v12 = vadd.f32 %v2212_v15, %v3658_v33 }
 0xab4   : > { %3087 = vrcp.f32 %v2067_v16  ;;  %v2367_v17 = vmul.f32 -1.442695, %v2137_v53 }
 0xab6   : > { %3089 = vpow2.f32 %v2367_v17 }
 0xabd   : > { %v3086_v19 = vpop.eup %3085 }
 0xabe   : > { %v3088_v23 = vpop.eup %3087  ;;  %v2216_v24 = vmul.f32 %v3086_v19, %v3753_v36 }
 0xabf   : > { %v2218_v40 = vmul.f32 %v3088_v23, %v1768_v20 }
 0xac0   : > { %v3090_v10 = vpop.eup %3089 }
 0xac1   : > { %v2143_v47 = vadd.f32 1.0, %v3090_v10  ;;  %v2219_v49 = vadd.f32 %v2218_v40, %v2216_v24 }
 0xac3   : > { %3091 = vrcp.f32 %v2143_v47 }
 0xacd   : > { %v3092_v41 = vpop.eup %3091 }
 0xace   : > { %v2220_v43 = vmul.f32 %v3092_v41, %v2213_v12 }
 0xad0   : > { %v2221_v54 = vadd.f32 %v2220_v43, %v2219_v49 }
 0xad2   : > { %v2223_v55 = vsel %vm2222_vm8, %v2221_v54, 0.0 }
 0xad3   : > { %2224 = vadd.xlane.f32.xlu0 %v2223_v55 }
 0xb60   : > { %v2225_v42 = vpop.xlane.xlu0 %2224 }
 0xb61   : > { %v2226_v56 = vmul.f32 0.03125, %v2225_v42 }
 0xb63   : > { %v2227_v59 = vsub.f32 %v2221_v54, %v2226_v56 }
 0xb65   : > { %v2228_v61 = vmul.f32 %v2227_v59, %v2227_v59 }
 0xb67   : > { %v2229_v31 = vsel %vm2222_vm8, %v2228_v61, 0.0 }
 0xb68   : > { %2230 = vadd.xlane.f32.xlu1 %v2229_v31 }
 0xb79   : > { %2245 = vperm.xlu1 %3050, %v2242_v29  }
 0xbf5   : > { %v2231_v32 = vpop.xlane.xlu1 %2230 }
 0xbf6   : > { %v2232_v62 = vmul.f32 0.03125, %v2231_v32 }
 0xbf8   : > { %v2233_v33 = vadd.f32 1e-05, %v2232_v62 }
 0xbf9   : > { %v2246_v6 = vpop.permute.xlu1 %2245 }
 0xbfa   : > { %3093 = vrsqrt.f32 %v2233_v33  ;;  %v2250_v37 = vmul.f32 %v2248_v7, %v2246_v6 }
 0xc04   : > { %v3094_v52 = vpop.eup %3093 }
 0xc05   : > { %v2235_v63 = vmul.f32 %v3094_v52, %v2227_v59 }
 0xc07   : > { %v2236_v3 = vmul.f32 %v2235_v63, %v3397_v44 }
 0xc09   : > { %v2237_v5 = vadd.f32 %v2236_v3, %v3402_v45 }
 0xc0b   : > { %v2239_v34 = vrot.slane %v2237_v5, 4 }
 0xc0d   : > { %v2241_v8 = vmul.f32 %v2239_v34, %v3333_v11 }
 0xc0f   : > { %v2251_v18 = vadd.f32 %v2250_v37, %v2241_v8 }
 0xc11   : > { %2253 = vst.msk [vmem:[%s551_s22 - $0x4] sm:$0x10] %vm2252_vm9, %v2251_v18 }
 0xc12   : > { %3108 = shalt.err (!%p3105_p3)
}
 0xc13   : > { %s3109_s29 = scalar_lea.hbm %s3821_s21, 16  ;;  %s3113_s2 = scalar_lea.hbm %s3880_s17, 32 }
 0xc14   : > { %p3110_p4 = scmp.ne.s32.totalorder %s3821_s21, %s3109_s29  ;;  %p3114_p9 = scmp.lt.u32.totalorder %s3821_s21, %s3880_s17 }
 0xc15   : > { %p3115_p10 = scmp.lt.u32.totalorder %s3113_s2, %s3109_s29  ;;  %p3117_p12 = scmp.lt.u32.totalorder %s3109_s29, %s3821_s21 }
 0xc16   : > { %p3111_p7 = pnand %p3110_p4, %p3292_p5 }
 0xc17   : > { %p3116_p11 = por %p3115_p10, %p3114_p9 }
 0xc18   : > { %p3112_p8 = pneg %p3111_p7 }
 0xc19   : > { %p3118_p13 = por %p3117_p12, %p3116_p11 }
 0xc1b   : > { %p3119_p0 = pnand %p3118_p13, %p3112_p8 }
 0xc1d   : > { %3122 = shalt.err (!%p3119_p0)
}
 0xc1e   : > { %3006 = dma.vmem_to_hbm [thread:$0]  (%p3292_p5), %s3823_s18, 16, %s3821_s21, %s2255_s23  }
 0xc1f PF: > { %p3012_p1 = scmp.ge.s32.totalorder %s3157_s27, 2  ;;  %s2279_s4 = sand.u32 1, %s3145_s24  }
 0xc20   : > { %s2280_s19 = scalar_lea.sflag [#allocation3], %s2279_s4 }
 0xc21   : > { %p3009_p2 = pnand %p3012_p1, %p3296_p6 }
 0xc23   : > { %3140 = dma.done.wait (!%p3009_p2), %s2280_s19, 16  }
 0xc24   : > { %3142 = vsyncadd (!%p3009_p2), %s2280_s19, 4294967280  ;;  %s3896_s28 = sld [smem:[#allocation5_spill]]  ;;  %s3897_s26 = sld [smem:[#allocation6_spill]] }
 0xc25   : > { %p27_p3 = scmp.ge.s32.totalorder %s3279_s0, 4   ;;  %s3898_s24 = smov %s3149_s25 }
 0xc26   : > { %s3900_s27 = smov %s3279_s0 }
 0xc27   :  { %29 = sbr.rel (!%p27_p3) target bundleno = 9 (0x9), region = 126 }
 0xc2a   : > { %s3899_s25 = smov %s3896_s28 }
 0xc2e   :  { %2284 = vsyncpa [#allocation3], 1 }
 0xc2f   :  { %2286 = vsyncpa [#allocation3 + $0x1], 1 }

</bundles_post_ra>
